<compile_context>
chip_gen: v7x
topology: tpu7x:2x2x1
jax: 0.10.0
libtpu: 0.0.40
codegen_flags: <defaults>
</compile_context>

<pallas_src>
import functools
import math

import jax
import jax.numpy as jnp
from jax import lax
from jax.experimental import pallas as pl
from jax.experimental.pallas import tpu as pltpu

# ----------------------------- toy config ------------------------------------
VOCAB = 512        # stands in for the GPT2 vocab (50257) at toy scale
HIDDEN = 256       # d_model (768 in the original); multiple of 128 -> lane-dense
NUM_HEADS = 2      # nhead (12 in the original)
NUM_LAYERS = 2     # num_layers (12 in the original)
FFN_DIM = 512      # dim_feedforward (2048 default) at toy scale
HEAD_DIM = HIDDEN // NUM_HEADS          # 128 -> head slices are lane-aligned
LN_EPS = 1e-5
SEQ = 8
BATCH = 2

MXU_DTYPE = jnp.bfloat16   # matmul-input dtype; accumulation stays f32 everywhere


# ----------------------------- fused multi-layer kernel ----------------------
def _fused_kernel(x_ref, wqkv_ref, bqkv_ref, wo_ref, bo_ref,
                  ln1g_ref, ln1b_ref, w1_ref, b1_ref, w2_ref, b2_ref,
                  ln2g_ref, ln2b_ref, wh_ref, bh_ref,
                  logits_ref, x_res, *, n_heads, head_dim, eps):
    """One grid step = one (batch, layer) pair of the transformer stack.

    grid = (BATCH, NUM_LAYERS): batch axis is "parallel" (megacore split on v7x),
    layer axis is "arbitrary" with the residual stream carried in the f32 VMEM
    scratch `x_res`.  lm_head runs as an epilogue on the last layer step.
    """
    layer = pl.program_id(1)
    n_layers = pl.num_programs(1)
    H = n_heads * head_dim

    # Layer 0: load this batch's embedded rows into the f32 residual carry.
    @pl.when(layer == 0)
    def _():
        x_res[...] = x_ref[...].astype(jnp.float32)

    x = x_res[...]                                    # (S, H) f32 residual stream
    xb = x.astype(MXU_DTYPE)

    # --- QKV projection (1/sqrt(head_dim) pre-folded into the Q weights/bias) ---
    qkv = jnp.dot(xb, wqkv_ref[...],
                  preferred_element_type=jnp.float32) + bqkv_ref[...]   # (S, 3H) f32
    q = qkv[:, 0 * H:1 * H].astype(MXU_DTYPE)         # cast once, wide (hoisted)
    k = qkv[:, 1 * H:2 * H].astype(MXU_DTYPE)
    v = qkv[:, 2 * H:3 * H].astype(MXU_DTYPE)

    # Head-major (nh, S, D) views from lane-aligned static slices.
    q3 = jnp.stack([q[:, h * head_dim:(h + 1) * head_dim] for h in range(n_heads)])
    k3 = jnp.stack([k[:, h * head_dim:(h + 1) * head_dim] for h in range(n_heads)])
    v3 = jnp.stack([v[:, h * head_dim:(h + 1) * head_dim] for h in range(n_heads)])

    # --- batched multi-head attention (contract on D; no per-head k transposes) ---
    s = jnp.einsum("hqd,hkd->hqk", q3, k3,
                   preferred_element_type=jnp.float32)                  # (nh, S, S)
    m = jnp.max(s, axis=-1, keepdims=True)
    pexp = jnp.exp(s - m)
    pexp = pexp * pl.reciprocal(jnp.sum(pexp, axis=-1, keepdims=True), approx=True)
    o3 = jnp.einsum("hqk,hkd->hqd", pexp.astype(MXU_DTYPE), v3,
                    preferred_element_type=jnp.float32)                 # (nh, S, D)
    attn = jnp.concatenate([o3[h] for h in range(n_heads)], axis=-1)    # (S, H) f32

    # --- out projection + residual + LayerNorm1 (f32 epilogue) ---
    a = jnp.dot(attn.astype(MXU_DTYPE), wo_ref[...],
                preferred_element_type=jnp.float32) + bo_ref[...]
    h1 = x + a
    mu1 = jnp.mean(h1, axis=-1, keepdims=True)
    var1 = jnp.mean(jnp.square(h1 - mu1), axis=-1, keepdims=True)
    x1 = (h1 - mu1) * lax.rsqrt(var1 + eps) * ln1g_ref[...] + ln1b_ref[...]

    # --- feed-forward (lin1 + ReLU + lin2) + residual + LayerNorm2 ---
    f = jnp.dot(x1.astype(MXU_DTYPE), w1_ref[...],
                preferred_element_type=jnp.float32) + b1_ref[...]
    f = jnp.maximum(f, 0.0)
    f = jnp.dot(f.astype(MXU_DTYPE), w2_ref[...],
                preferred_element_type=jnp.float32) + b2_ref[...]
    h2 = x1 + f
    mu2 = jnp.mean(h2, axis=-1, keepdims=True)
    var2 = jnp.mean(jnp.square(h2 - mu2), axis=-1, keepdims=True)
    x2 = (h2 - mu2) * lax.rsqrt(var2 + eps) * ln2g_ref[...] + ln2b_ref[...]

    x_res[...] = x2                                   # f32 carry to the next layer

    # --- last layer: fused lm_head epilogue (lane-dense 512-wide output) ---
    @pl.when(layer == n_layers - 1)
    def _():
        logits_ref[...] = (jnp.dot(x2.astype(MXU_DTYPE), wh_ref[...],
                                   preferred_element_type=jnp.float32) + bh_ref[...])


def fused_forward(x0, p, seq):
    """x0: (BATCH*seq, H) bf16 batch-major slab -> logits (BATCH*seq, VOCAB) f32."""
    T, H = x0.shape
    n_batch = T // seq
    n_layers = p["w_qkv"].shape[0]
    F = p["w1"].shape[-1]
    V = p["w_head"].shape[-1]
    kernel = functools.partial(_fused_kernel, n_heads=NUM_HEADS,
                               head_dim=HEAD_DIM, eps=LN_EPS)

    def lspec(*dims):      # stacked per-layer weight: pick layer i, squeeze axis 0
        return pl.BlockSpec((None,) + dims, lambda b, i: (i,) + (0,) * len(dims))

    def fixed(*dims):      # layer/batch-invariant (lm_head): stays VMEM-resident
        return pl.BlockSpec(dims, lambda b, i, _n=len(dims): (0,) * _n)

    # TODO(synk): at real GPT-3 sizes, tile H/F/V dims and set vmem_limit_bytes per
    # generation (v7x has 64 MiB physical VMEM vs 128 MiB on v5e/v6e).
    return pl.pallas_call(
        kernel,
        out_shape=jax.ShapeDtypeStruct((T, V), jnp.float32),
        grid=(n_batch, n_layers),
        in_specs=[
            pl.BlockSpec((seq, H), lambda b, i: (b, 0)),       # x0 (per-batch rows)
            lspec(H, 3 * H), lspec(1, 3 * H),                  # w_qkv, b_qkv
            lspec(H, H), lspec(1, H),                          # w_out, b_out
            lspec(1, H), lspec(1, H),                          # ln1_g, ln1_b
            lspec(H, F), lspec(1, F),                          # w1, b1
            lspec(F, H), lspec(1, H),                          # w2, b2
            lspec(1, H), lspec(1, H),                          # ln2_g, ln2_b
            fixed(H, V), fixed(1, V),                          # w_head, b_head
        ],
        out_specs=pl.BlockSpec((seq, V), lambda b, i: (b, 0)),
        scratch_shapes=[pltpu.VMEM((seq, H), jnp.float32)],    # f32 residual carry
        compiler_params=pltpu.CompilerParams(
            dimension_semantics=("parallel", "arbitrary")),
    )(x0, p["w_qkv"], p["b_qkv"], p["w_out"], p["b_out"],
      p["ln1_g"], p["ln1_b"], p["w1"], p["b1"], p["w2"], p["b2"],
      p["ln2_g"], p["ln2_b"], p["w_head"], p["b_head"])


# ----------------------------- model assembly --------------------------------
def model_forward(input_ids, packed):
    """input_ids: (L, N) int32 (seq-first, PyTorch default) -> logits (L, N, V)."""
    L, N = input_ids.shape
    V = packed["w_head"].shape[-1]
    # Embedding lookup is a dynamic gather -> plain JAX glue (not the hot path).
    # TODO(synk): fold the gather into the fused kernel via PrefetchScalarGridSpec
    # scalar-prefetched ids + a pl.Element row gather on the embedding table.
    ids_bm = input_ids.T.reshape(-1)                    # batch-major rows: n*L + l
    x0 = packed["emb"][ids_bm].astype(MXU_DTYPE)        # (N*L, H)
    logits = fused_forward(x0, packed, seq=L)           # (N*L, V) f32
    return logits.reshape(N, L, V).transpose(1, 0, 2)   # back to seq-first (L, N, V)


# ----------------------------- params ----------------------------------------
def init_params(key):
    """Natural-form (per-layer, unfolded, f32) parameters for the reference."""
    def w(k, shape, scale=0.02):
        # Draw in f32, round to the bf16 grid so the kernel's bf16 copies are exact.
        v = scale * jax.random.normal(k, shape, jnp.float32)
        return v.astype(jnp.bfloat16).astype(jnp.float32)

    keys = jax.random.split(key, 2 + NUM_LAYERS)
    params = {
        "emb": w(keys[0], (VOCAB, HIDDEN)),
        # All matmul weights stored pre-transposed as (in, out).
        "w_head": w(keys[1], (HIDDEN, VOCAB)),
        "b_head": jnp.zeros((1, VOCAB), jnp.float32),
        "layers": [],
    }
    for i in range(NUM_LAYERS):
        k = jax.random.split(keys[2 + i], 8)
        params["layers"].append({
            "w_qkv": w(k[0], (HIDDEN, 3 * HIDDEN)),
            "b_qkv": w(k[1], (1, 3 * HIDDEN)),
            "w_out": w(k[2], (HIDDEN, HIDDEN)),
            "b_out": w(k[3], (1, HIDDEN)),
            "ln1_g": jnp.ones((1, HIDDEN), jnp.float32),
            "ln1_b": jnp.zeros((1, HIDDEN), jnp.float32),
            "w1": w(k[4], (HIDDEN, FFN_DIM)),
            "b1": w(k[5], (1, FFN_DIM)),
            "w2": w(k[6], (FFN_DIM, HIDDEN)),
            "b2": w(k[7], (1, HIDDEN)),
            "ln2_g": jnp.ones((1, HIDDEN), jnp.float32),
            "ln2_b": jnp.zeros((1, HIDDEN), jnp.float32),
        })
    return params


def pack_params(params):
    """Stack per-layer weights on a leading layer axis + fold the attention scale."""
    layers = params["layers"]

    def stack(name, dtype):
        return jnp.stack([lp[name] for lp in layers]).astype(dtype)

    scale = 1.0 / math.sqrt(HEAD_DIM)
    w_qkv = stack("w_qkv", jnp.float32)        # (L, H, 3H)
    b_qkv = stack("b_qkv", jnp.float32)        # (L, 1, 3H)
    # One-time weight transform: fold 1/sqrt(head_dim) into the Q projection.
    w_qkv = w_qkv.at[:, :, :HIDDEN].multiply(scale)
    b_qkv = b_qkv.at[:, :, :HIDDEN].multiply(scale)
    return {
        "w_qkv": w_qkv.astype(MXU_DTYPE),
        "b_qkv": b_qkv,
        "w_out": stack("w_out", MXU_DTYPE), "b_out": stack("b_out", jnp.float32),
        "ln1_g": stack("ln1_g", jnp.float32), "ln1_b": stack("ln1_b", jnp.float32),
        "w1": stack("w1", MXU_DTYPE), "b1": stack("b1", jnp.float32),
        "w2": stack("w2", MXU_DTYPE), "b2": stack("b2", jnp.float32),
        "ln2_g": stack("ln2_g", jnp.float32), "ln2_b": stack("ln2_b", jnp.float32),
        "w_head": params["w_head"].astype(MXU_DTYPE),
        "b_head": params["b_head"].astype(jnp.float32),
        "emb": params["emb"].astype(jnp.float32),
    }


# ----------------------------- pure-jnp reference ----------------------------
def ref_forward(input_ids, params):
    """Pure-jnp f32 reference with identical math (seq-first layout)."""
    x = params["emb"][input_ids]                         # (L, N, H)
    L, N, H = x.shape
    for p in params["layers"]:
        x2 = x.reshape(L * N, H)
        qkv = x2 @ p["w_qkv"] + p["b_qkv"][0]
        qkv = qkv.reshape(L, N, 3, NUM_HEADS, HEAD_DIM)
        q = qkv[:, :, 0].transpose(1, 2, 0, 3)
        k = qkv[:, :, 1].transpose(1, 2, 0, 3)
        v = qkv[:, :, 2].transpose(1, 2, 0, 3)
        s = jnp.einsum("bhqd,bhkd->bhqk", q, k) / math.sqrt(HEAD_DIM)
        a = jax.nn.softmax(s, axis=-1)
        o = jnp.einsum("bhqk,bhkd->bhqd", a, v)
        o = o.transpose(2, 0, 1, 3).reshape(L * N, H)
        o = o @ p["w_out"] + p["b_out"][0]
        h = x2 + o
        mu = h.mean(-1, keepdims=True)
        var = jnp.square(h - mu).mean(-1, keepdims=True)
        x2 = (h - mu) / jnp.sqrt(var + LN_EPS) * p["ln1_g"][0] + p["ln1_b"][0]
        f = jnp.maximum(x2 @ p["w1"] + p["b1"][0], 0.0)
        f = f @ p["w2"] + p["b2"][0]
        h = x2 + f
        mu = h.mean(-1, keepdims=True)
        var = jnp.square(h - mu).mean(-1, keepdims=True)
        x2 = (h - mu) / jnp.sqrt(var + LN_EPS) * p["ln2_g"][0] + p["ln2_b"][0]
        x = x2.reshape(L, N, H)
    logits = x.reshape(L * N, H) @ params["w_head"] + params["b_head"][0]
    return logits.reshape(L, N, VOCAB)


# ----------------------------- main -------------------------------------------
if __name__ == "__main__":
    key = jax.random.PRNGKey(0)
    pkey, ikey = jax.random.split(key)
    params = init_params(pkey)
    packed = pack_params(params)
    input_ids = jax.random.randint(ikey, (SEQ, BATCH), 0, VOCAB, dtype=jnp.int32)

    fwd = jax.jit(model_forward)
    logits = jax.block_until_ready(fwd(input_ids, packed))
    ref = jax.block_until_ready(ref_forward(input_ids, params))

    assert logits.shape == (SEQ, BATCH, VOCAB), logits.shape
    assert bool(jnp.all(jnp.isfinite(logits)))
    err = float(jnp.max(jnp.abs(logits - ref)))
    # Tolerance covers bf16 MXU inputs, the bf16-folded attention scale, and the
    # approx softmax reciprocal vs. the pure-f32 reference (residual carried f32).
    assert err < 6e-2, f"mismatch vs reference: max abs err {err}"
    print("KERNEL_OK")
</pallas_src>

<mosaic_0001>
module attributes {stable_mosaic.version = 11 : i64} {
  func.func @_fused_kernel(%arg0: i32, %arg1: i32, %arg2: memref<8x256xbf16, #tpu.memory_space<vmem>>, %arg3: memref<1x256x768xbf16, #tpu.memory_space<vmem>>, %arg4: memref<1x1x768xf32, #tpu.memory_space<vmem>>, %arg5: memref<1x256x256xbf16, #tpu.memory_space<vmem>>, %arg6: memref<1x1x256xf32, #tpu.memory_space<vmem>>, %arg7: memref<1x1x256xf32, #tpu.memory_space<vmem>>, %arg8: memref<1x1x256xf32, #tpu.memory_space<vmem>>, %arg9: memref<1x256x512xbf16, #tpu.memory_space<vmem>>, %arg10: memref<1x1x512xf32, #tpu.memory_space<vmem>>, %arg11: memref<1x512x256xbf16, #tpu.memory_space<vmem>>, %arg12: memref<1x1x256xf32, #tpu.memory_space<vmem>>, %arg13: memref<1x1x256xf32, #tpu.memory_space<vmem>>, %arg14: memref<1x1x256xf32, #tpu.memory_space<vmem>>, %arg15: memref<256x512xbf16, #tpu.memory_space<vmem>>, %arg16: memref<1x512xf32, #tpu.memory_space<vmem>>, %arg17: memref<8x512xf32, #tpu.memory_space<vmem>>, %arg18: memref<8x256xf32, #tpu.memory_space<vmem>>) attributes {dimension_semantics = [#tpu.dimension_semantics<parallel>, #tpu.dimension_semantics<arbitrary>], iteration_bounds = array<i64: 2, 2>, scalar_prefetch = 0 : i64, scratch_operands = 1 : i64, tpu.core_type = #tpu.core_type<tc>, window_params = [{transform_indices = @transform_0, window_bounds = array<i64: 8, 256>}, {transform_indices = @transform_1, window_bounds = array<i64: 1, 256, 768>}, {transform_indices = @transform_2, window_bounds = array<i64: 1, 1, 768>}, {transform_indices = @transform_3, window_bounds = array<i64: 1, 256, 256>}, {transform_indices = @transform_4, window_bounds = array<i64: 1, 1, 256>}, {transform_indices = @transform_5, window_bounds = array<i64: 1, 1, 256>}, {transform_indices = @transform_6, window_bounds = array<i64: 1, 1, 256>}, {transform_indices = @transform_7, window_bounds = array<i64: 1, 256, 512>}, {transform_indices = @transform_8, window_bounds = array<i64: 1, 1, 512>}, {transform_indices = @transform_9, window_bounds = array<i64: 1, 512, 256>}, {transform_indices = @transform_10, window_bounds = array<i64: 1, 1, 256>}, {transform_indices = @transform_11, window_bounds = array<i64: 1, 1, 256>}, {transform_indices = @transform_12, window_bounds = array<i64: 1, 1, 256>}, {pipeline_mode = #tpu.pipeline_mode<synchronous>, transform_indices = @transform_13, window_bounds = array<i64: 256, 512>}, {pipeline_mode = #tpu.pipeline_mode<synchronous>, transform_indices = @transform_14, window_bounds = array<i64: 1, 512>}, {transform_indices = @transform_15, window_bounds = array<i64: 8, 512>}]} {
    %c0_i32 = arith.constant 0 : i32
    %0 = arith.cmpi eq, %arg1, %c0_i32 : i32
    %1 = arith.extui %0 : i1 to i32
    %c0_i32_0 = arith.constant 0 : i32
    %2 = arith.cmpi ne, %1, %c0_i32_0 : i32
    scf.if %2 {
      %c0_59 = arith.constant 0 : index
      %c0_60 = arith.constant 0 : index
      %135 = vector.load %arg2[%c0_59, %c0_60] : memref<8x256xbf16, #tpu.memory_space<vmem>>, vector<8x256xbf16>
      %136 = arith.extf %135 : vector<8x256xbf16> to vector<8x256xf32>
      %c0_61 = arith.constant 0 : index
      %c0_62 = arith.constant 0 : index
      %137 = vector.load %arg18[%c0_61, %c0_62] : memref<8x256xf32, #tpu.memory_space<vmem>>, vector<8x256xf32>
      tpu.vector_store %arg18[%c0_61, %c0_62], %136 {strides = array<i32>} : memref<8x256xf32, #tpu.memory_space<vmem>>, vector<8x256xf32>,
    } else {
    }
    %c0 = arith.constant 0 : index
    %c0_1 = arith.constant 0 : index
    %3 = vector.load %arg18[%c0, %c0_1] : memref<8x256xf32, #tpu.memory_space<vmem>>, vector<8x256xf32>
    %4 = arith.truncf %3 : vector<8x256xf32> to vector<8x256xbf16>
    %c0_2 = arith.constant 0 : index
    %c0_3 = arith.constant 0 : index
    %c0_4 = arith.constant 0 : index
    %5 = vector.load %arg3[%c0_2, %c0_3, %c0_4] : memref<1x256x768xbf16, #tpu.memory_space<vmem>>, vector<1x256x768xbf16>
    %6 = vector.shape_cast %5 : vector<1x256x768xbf16> to vector<256x768xbf16>
    %cst = arith.constant dense<0.000000e+00> : vector<8x768xf32>
    %7 = tpu.matmul %4, %6, %cst {dimension_numbers = #tpu.dot_dimension_numbers<[1], [0], [0], [1], [0, 0, 1, 1], [], []>} : vector<8x256xbf16>, vector<256x768xbf16>, vector<8x768xf32> -> vector<8x768xf32>
    %c0_5 = arith.constant 0 : index
    %c0_6 = arith.constant 0 : index
    %c0_7 = arith.constant 0 : index
    %8 = vector.load %arg4[%c0_5, %c0_6, %c0_7] : memref<1x1x768xf32, #tpu.memory_space<vmem>>, vector<1x1x768xf32>
    %9 = vector.shape_cast %8 : vector<1x1x768xf32> to vector<1x768xf32>
    %10 = vector.broadcast %9 : vector<1x768xf32> to vector<8x768xf32>
    %11 = arith.addf %7, %10 : vector<8x768xf32>
    %12 = vector.extract_strided_slice %11 {offsets = [0, 0], sizes = [8, 256], strides = [1, 1]} : vector<8x768xf32> to vector<8x256xf32>
    %13 = arith.truncf %12 : vector<8x256xf32> to vector<8x256xbf16>
    %14 = vector.extract_strided_slice %11 {offsets = [0, 256], sizes = [8, 256], strides = [1, 1]} : vector<8x768xf32> to vector<8x256xf32>
    %15 = arith.truncf %14 : vector<8x256xf32> to vector<8x256xbf16>
    %16 = vector.extract_strided_slice %11 {offsets = [0, 512], sizes = [8, 256], strides = [1, 1]} : vector<8x768xf32> to vector<8x256xf32>
    %17 = arith.truncf %16 : vector<8x256xf32> to vector<8x256xbf16>
    %18 = vector.extract_strided_slice %13 {offsets = [0, 0], sizes = [8, 128], strides = [1, 1]} : vector<8x256xbf16> to vector<8x128xbf16>
    %19 = vector.extract_strided_slice %13 {offsets = [0, 128], sizes = [8, 128], strides = [1, 1]} : vector<8x256xbf16> to vector<8x128xbf16>
    %20 = vector.shape_cast %18 : vector<8x128xbf16> to vector<1x8x128xbf16>
    %21 = vector.shape_cast %19 : vector<8x128xbf16> to vector<1x8x128xbf16>
    %22 = tpu.concatenate %20, %21 in 0 : vector<1x8x128xbf16>, vector<1x8x128xbf16> -> vector<2x8x128xbf16>
    %23 = vector.extract_strided_slice %15 {offsets = [0, 0], sizes = [8, 128], strides = [1, 1]} : vector<8x256xbf16> to vector<8x128xbf16>
    %24 = vector.extract_strided_slice %15 {offsets = [0, 128], sizes = [8, 128], strides = [1, 1]} : vector<8x256xbf16> to vector<8x128xbf16>
    %25 = vector.shape_cast %23 : vector<8x128xbf16> to vector<1x8x128xbf16>
    %26 = vector.shape_cast %24 : vector<8x128xbf16> to vector<1x8x128xbf16>
    %27 = tpu.concatenate %25, %26 in 0 : vector<1x8x128xbf16>, vector<1x8x128xbf16> -> vector<2x8x128xbf16>
    %28 = vector.extract_strided_slice %17 {offsets = [0, 0], sizes = [8, 128], strides = [1, 1]} : vector<8x256xbf16> to vector<8x128xbf16>
    %29 = vector.extract_strided_slice %17 {offsets = [0, 128], sizes = [8, 128], strides = [1, 1]} : vector<8x256xbf16> to vector<8x128xbf16>
    %30 = vector.shape_cast %28 : vector<8x128xbf16> to vector<1x8x128xbf16>
    %31 = vector.shape_cast %29 : vector<8x128xbf16> to vector<1x8x128xbf16>
    %32 = tpu.concatenate %30, %31 in 0 : vector<1x8x128xbf16>, vector<1x8x128xbf16> -> vector<2x8x128xbf16>
    "tpu.trace_start"() <{level = 10 : i32, message = "hqd,hkd->hqk"}> : () -> ()
    %cst_8 = arith.constant dense<0.000000e+00> : vector<2x8x8xf32>
    %33 = tpu.matmul %22, %27, %cst_8 {dimension_numbers = #tpu.dot_dimension_numbers<[2], [2], [1], [1], [0, 0, 0, 1, 1, 1], [0], [0]>} : vector<2x8x128xbf16>, vector<2x8x128xbf16>, vector<2x8x8xf32> -> vector<2x8x8xf32>
    "tpu.trace_stop"() : () -> ()
    %cst_9 = arith.constant dense<0xFF800000> : vector<2x8xf32>
    %34 = vector.multi_reduction <maximumf>, %33, %cst_9 [2] : vector<2x8x8xf32> to vector<2x8xf32>
    %35 = vector.shape_cast %34 : vector<2x8xf32> to vector<2x8x1xf32>
    %36 = vector.broadcast %35 : vector<2x8x1xf32> to vector<2x8x8xf32>
    %37 = arith.subf %33, %36 : vector<2x8x8xf32>
    %38 = math.exp %37 : vector<2x8x8xf32>
    %cst_10 = arith.constant dense<0.000000e+00> : vector<2x8xf32>
    %39 = vector.multi_reduction <add>, %38, %cst_10 [2] : vector<2x8x8xf32> to vector<2x8xf32>
    %40 = vector.shape_cast %39 : vector<2x8xf32> to vector<2x8x1xf32>
    %41 = tpu.reciprocal %40 {approx = true} : vector<2x8x1xf32> -> vector<2x8x1xf32>
    %42 = vector.broadcast %41 : vector<2x8x1xf32> to vector<2x8x8xf32>
    %43 = arith.mulf %38, %42 : vector<2x8x8xf32>
    %44 = arith.truncf %43 : vector<2x8x8xf32> to vector<2x8x8xbf16>
    "tpu.trace_start"() <{level = 10 : i32, message = "hqk,hkd->hqd"}> : () -> ()
    %cst_11 = arith.constant dense<0.000000e+00> : vector<2x8x128xf32>
    %45 = tpu.matmul %44, %32, %cst_11 {dimension_numbers = #tpu.dot_dimension_numbers<[2], [1], [1], [2], [0, 0, 0, 1, 1, 2], [0], [0]>} : vector<2x8x8xbf16>, vector<2x8x128xbf16>, vector<2x8x128xf32> -> vector<2x8x128xf32>
    "tpu.trace_stop"() : () -> ()
    %46 = vector.extract_strided_slice %45 {offsets = [0, 0, 0], sizes = [1, 8, 128], strides = [1, 1, 1]} : vector<2x8x128xf32> to vector<1x8x128xf32>
    %47 = vector.shape_cast %46 : vector<1x8x128xf32> to vector<8x128xf32>
    %48 = vector.extract_strided_slice %45 {offsets = [1, 0, 0], sizes = [1, 8, 128], strides = [1, 1, 1]} : vector<2x8x128xf32> to vector<1x8x128xf32>
    %49 = vector.shape_cast %48 : vector<1x8x128xf32> to vector<8x128xf32>
    %50 = tpu.concatenate %47, %49 in 1 : vector<8x128xf32>, vector<8x128xf32> -> vector<8x256xf32>
    %51 = arith.truncf %50 : vector<8x256xf32> to vector<8x256xbf16>
    %c0_12 = arith.constant 0 : index
    %c0_13 = arith.constant 0 : index
    %c0_14 = arith.constant 0 : index
    %52 = vector.load %arg5[%c0_12, %c0_13, %c0_14] : memref<1x256x256xbf16, #tpu.memory_space<vmem>>, vector<1x256x256xbf16>
    %53 = vector.shape_cast %52 : vector<1x256x256xbf16> to vector<256x256xbf16>
    %cst_15 = arith.constant dense<0.000000e+00> : vector<8x256xf32>
    %54 = tpu.matmul %51, %53, %cst_15 {dimension_numbers = #tpu.dot_dimension_numbers<[1], [0], [0], [1], [0, 0, 1, 1], [], []>} : vector<8x256xbf16>, vector<256x256xbf16>, vector<8x256xf32> -> vector<8x256xf32>
    %c0_16 = arith.constant 0 : index
    %c0_17 = arith.constant 0 : index
    %c0_18 = arith.constant 0 : index
    %55 = vector.load %arg6[%c0_16, %c0_17, %c0_18] : memref<1x1x256xf32, #tpu.memory_space<vmem>>, vector<1x1x256xf32>
    %56 = vector.shape_cast %55 : vector<1x1x256xf32> to vector<1x256xf32>
    %57 = vector.broadcast %56 : vector<1x256xf32> to vector<8x256xf32>
    %58 = arith.addf %54, %57 : vector<8x256xf32>
    %59 = arith.addf %3, %58 : vector<8x256xf32>
    %cst_19 = arith.constant dense<0.000000e+00> : vector<8xf32>
    %60 = vector.multi_reduction <add>, %59, %cst_19 [1] : vector<8x256xf32> to vector<8xf32>
    %61 = vector.shape_cast %60 : vector<8xf32> to vector<8x1xf32>
    %cst_20 = arith.constant 2.560000e+02 : f32
    %62 = vector.broadcast %cst_20 : f32 to vector<8x1xf32>
    %63 = arith.divf %61, %62 : vector<8x1xf32>
    %64 = vector.broadcast %63 : vector<8x1xf32> to vector<8x256xf32>
    %65 = arith.subf %59, %64 : vector<8x256xf32>
    %66 = arith.mulf %65, %65 : vector<8x256xf32>
    %cst_21 = arith.constant dense<0.000000e+00> : vector<8xf32>
    %67 = vector.multi_reduction <add>, %66, %cst_21 [1] : vector<8x256xf32> to vector<8xf32>
    %68 = vector.shape_cast %67 : vector<8xf32> to vector<8x1xf32>
    %cst_22 = arith.constant 2.560000e+02 : f32
    %69 = vector.broadcast %cst_22 : f32 to vector<8x1xf32>
    %70 = arith.divf %68, %69 : vector<8x1xf32>
    %71 = vector.broadcast %63 : vector<8x1xf32> to vector<8x256xf32>
    %72 = arith.subf %59, %71 : vector<8x256xf32>
    %cst_23 = arith.constant 9.99999974E-6 : f32
    %73 = vector.broadcast %cst_23 : f32 to vector<8x1xf32>
    %74 = arith.addf %70, %73 : vector<8x1xf32>
    %75 = math.rsqrt %74 : vector<8x1xf32>
    %76 = vector.broadcast %75 : vector<8x1xf32> to vector<8x256xf32>
    %77 = arith.mulf %72, %76 : vector<8x256xf32>
    %c0_24 = arith.constant 0 : index
    %c0_25 = arith.constant 0 : index
    %c0_26 = arith.constant 0 : index
    %78 = vector.load %arg7[%c0_24, %c0_25, %c0_26] : memref<1x1x256xf32, #tpu.memory_space<vmem>>, vector<1x1x256xf32>
    %79 = vector.shape_cast %78 : vector<1x1x256xf32> to vector<1x256xf32>
    %80 = vector.broadcast %79 : vector<1x256xf32> to vector<8x256xf32>
    %81 = arith.mulf %77, %80 : vector<8x256xf32>
    %c0_27 = arith.constant 0 : index
    %c0_28 = arith.constant 0 : index
    %c0_29 = arith.constant 0 : index
    %82 = vector.load %arg8[%c0_27, %c0_28, %c0_29] : memref<1x1x256xf32, #tpu.memory_space<vmem>>, vector<1x1x256xf32>
    %83 = vector.shape_cast %82 : vector<1x1x256xf32> to vector<1x256xf32>
    %84 = vector.broadcast %83 : vector<1x256xf32> to vector<8x256xf32>
    %85 = arith.addf %81, %84 : vector<8x256xf32>
    %86 = arith.truncf %85 : vector<8x256xf32> to vector<8x256xbf16>
    %c0_30 = arith.constant 0 : index
    %c0_31 = arith.constant 0 : index
    %c0_32 = arith.constant 0 : index
    %87 = vector.load %arg9[%c0_30, %c0_31, %c0_32] : memref<1x256x512xbf16, #tpu.memory_space<vmem>>, vector<1x256x512xbf16>
    %88 = vector.shape_cast %87 : vector<1x256x512xbf16> to vector<256x512xbf16>
    %cst_33 = arith.constant dense<0.000000e+00> : vector<8x512xf32>
    %89 = tpu.matmul %86, %88, %cst_33 {dimension_numbers = #tpu.dot_dimension_numbers<[1], [0], [0], [1], [0, 0, 1, 1], [], []>} : vector<8x256xbf16>, vector<256x512xbf16>, vector<8x512xf32> -> vector<8x512xf32>
    %c0_34 = arith.constant 0 : index
    %c0_35 = arith.constant 0 : index
    %c0_36 = arith.constant 0 : index
    %90 = vector.load %arg10[%c0_34, %c0_35, %c0_36] : memref<1x1x512xf32, #tpu.memory_space<vmem>>, vector<1x1x512xf32>
    %91 = vector.shape_cast %90 : vector<1x1x512xf32> to vector<1x512xf32>
    %92 = vector.broadcast %91 : vector<1x512xf32> to vector<8x512xf32>
    %93 = arith.addf %89, %92 : vector<8x512xf32>
    %cst_37 = arith.constant 0.000000e+00 : f32
    %94 = vector.broadcast %cst_37 : f32 to vector<8x512xf32>
    %95 = arith.maximumf %93, %94 : vector<8x512xf32>
    %96 = arith.truncf %95 : vector<8x512xf32> to vector<8x512xbf16>
    %c0_38 = arith.constant 0 : index
    %c0_39 = arith.constant 0 : index
    %c0_40 = arith.constant 0 : index
    %97 = vector.load %arg11[%c0_38, %c0_39, %c0_40] : memref<1x512x256xbf16, #tpu.memory_space<vmem>>, vector<1x512x256xbf16>
    %98 = vector.shape_cast %97 : vector<1x512x256xbf16> to vector<512x256xbf16>
    %cst_41 = arith.constant dense<0.000000e+00> : vector<8x256xf32>
    %99 = tpu.matmul %96, %98, %cst_41 {dimension_numbers = #tpu.dot_dimension_numbers<[1], [0], [0], [1], [0, 0, 1, 1], [], []>} : vector<8x512xbf16>, vector<512x256xbf16>, vector<8x256xf32> -> vector<8x256xf32>
    %c0_42 = arith.constant 0 : index
    %c0_43 = arith.constant 0 : index
    %c0_44 = arith.constant 0 : index
    %100 = vector.load %arg12[%c0_42, %c0_43, %c0_44] : memref<1x1x256xf32, #tpu.memory_space<vmem>>, vector<1x1x256xf32>
    %101 = vector.shape_cast %100 : vector<1x1x256xf32> to vector<1x256xf32>
    %102 = vector.broadcast %101 : vector<1x256xf32> to vector<8x256xf32>
    %103 = arith.addf %99, %102 : vector<8x256xf32>
    %104 = arith.addf %85, %103 : vector<8x256xf32>
    %cst_45 = arith.constant dense<0.000000e+00> : vector<8xf32>
    %105 = vector.multi_reduction <add>, %104, %cst_45 [1] : vector<8x256xf32> to vector<8xf32>
    %106 = vector.shape_cast %105 : vector<8xf32> to vector<8x1xf32>
    %cst_46 = arith.constant 2.560000e+02 : f32
    %107 = vector.broadcast %cst_46 : f32 to vector<8x1xf32>
    %108 = arith.divf %106, %107 : vector<8x1xf32>
    %109 = vector.broadcast %108 : vector<8x1xf32> to vector<8x256xf32>
    %110 = arith.subf %104, %109 : vector<8x256xf32>
    %111 = arith.mulf %110, %110 : vector<8x256xf32>
    %cst_47 = arith.constant dense<0.000000e+00> : vector<8xf32>
    %112 = vector.multi_reduction <add>, %111, %cst_47 [1] : vector<8x256xf32> to vector<8xf32>
    %113 = vector.shape_cast %112 : vector<8xf32> to vector<8x1xf32>
    %cst_48 = arith.constant 2.560000e+02 : f32
    %114 = vector.broadcast %cst_48 : f32 to vector<8x1xf32>
    %115 = arith.divf %113, %114 : vector<8x1xf32>
    %116 = vector.broadcast %108 : vector<8x1xf32> to vector<8x256xf32>
    %117 = arith.subf %104, %116 : vector<8x256xf32>
    %cst_49 = arith.constant 9.99999974E-6 : f32
    %118 = vector.broadcast %cst_49 : f32 to vector<8x1xf32>
    %119 = arith.addf %115, %118 : vector<8x1xf32>
    %120 = math.rsqrt %119 : vector<8x1xf32>
    %121 = vector.broadcast %120 : vector<8x1xf32> to vector<8x256xf32>
    %122 = arith.mulf %117, %121 : vector<8x256xf32>
    %c0_50 = arith.constant 0 : index
    %c0_51 = arith.constant 0 : index
    %c0_52 = arith.constant 0 : index
    %123 = vector.load %arg13[%c0_50, %c0_51, %c0_52] : memref<1x1x256xf32, #tpu.memory_space<vmem>>, vector<1x1x256xf32>
    %124 = vector.shape_cast %123 : vector<1x1x256xf32> to vector<1x256xf32>
    %125 = vector.broadcast %124 : vector<1x256xf32> to vector<8x256xf32>
    %126 = arith.mulf %122, %125 : vector<8x256xf32>
    %c0_53 = arith.constant 0 : index
    %c0_54 = arith.constant 0 : index
    %c0_55 = arith.constant 0 : index
    %127 = vector.load %arg14[%c0_53, %c0_54, %c0_55] : memref<1x1x256xf32, #tpu.memory_space<vmem>>, vector<1x1x256xf32>
    %128 = vector.shape_cast %127 : vector<1x1x256xf32> to vector<1x256xf32>
    %129 = vector.broadcast %128 : vector<1x256xf32> to vector<8x256xf32>
    %130 = arith.addf %126, %129 : vector<8x256xf32>
    %c0_56 = arith.constant 0 : index
    %c0_57 = arith.constant 0 : index
    %131 = vector.load %arg18[%c0_56, %c0_57] : memref<8x256xf32, #tpu.memory_space<vmem>>, vector<8x256xf32>
    tpu.vector_store %arg18[%c0_56, %c0_57], %130 {strides = array<i32>} : memref<8x256xf32, #tpu.memory_space<vmem>>, vector<8x256xf32>,
    %c1_i32 = arith.constant 1 : i32
    %132 = arith.cmpi eq, %arg1, %c1_i32 : i32
    %133 = arith.extui %132 : i1 to i32
    %c0_i32_58 = arith.constant 0 : i32
    %134 = arith.cmpi ne, %133, %c0_i32_58 : i32
    scf.if %134 {
      %135 = arith.truncf %130 : vector<8x256xf32> to vector<8x256xbf16>
      %c0_59 = arith.constant 0 : index
      %c0_60 = arith.constant 0 : index
      %136 = vector.load %arg15[%c0_59, %c0_60] : memref<256x512xbf16, #tpu.memory_space<vmem>>, vector<256x512xbf16>
      %cst_61 = arith.constant dense<0.000000e+00> : vector<8x512xf32>
      %137 = tpu.matmul %135, %136, %cst_61 {dimension_numbers = #tpu.dot_dimension_numbers<[1], [0], [0], [1], [0, 0, 1, 1], [], []>} : vector<8x256xbf16>, vector<256x512xbf16>, vector<8x512xf32> -> vector<8x512xf32>
      %c0_62 = arith.constant 0 : index
      %c0_63 = arith.constant 0 : index
      %138 = vector.load %arg16[%c0_62, %c0_63] : memref<1x512xf32, #tpu.memory_space<vmem>>, vector<1x512xf32>
      %139 = vector.broadcast %138 : vector<1x512xf32> to vector<8x512xf32>
      %140 = arith.addf %137, %139 : vector<8x512xf32>
      %c0_64 = arith.constant 0 : index
      %c0_65 = arith.constant 0 : index
      %141 = vector.load %arg17[%c0_64, %c0_65] : memref<8x512xf32, #tpu.memory_space<vmem>>, vector<8x512xf32>
      tpu.vector_store %arg17[%c0_64, %c0_65], %140 {strides = array<i32>} : memref<8x512xf32, #tpu.memory_space<vmem>>, vector<8x512xf32>,
    } else {
    }
    return
  }
  func.func @transform_0(%arg0: i32, %arg1: i32) -> (i32, i32) {
    %c0_i32 = arith.constant 0 : i32
    %c0_i32_0 = arith.constant 0 : i32
    return %arg0, %c0_i32 : i32, i32
  }
  func.func @transform_1(%arg0: i32, %arg1: i32) -> (i32, i32, i32) {
    %c0_i32 = arith.constant 0 : i32
    %c0_i32_0 = arith.constant 0 : i32
    %c0_i32_1 = arith.constant 0 : i32
    return %arg1, %c0_i32, %c0_i32_0 : i32, i32, i32
  }
  func.func @transform_2(%arg0: i32, %arg1: i32) -> (i32, i32, i32) {
    %c0_i32 = arith.constant 0 : i32
    %c0_i32_0 = arith.constant 0 : i32
    %c0_i32_1 = arith.constant 0 : i32
    return %arg1, %c0_i32, %c0_i32_0 : i32, i32, i32
  }
  func.func @transform_3(%arg0: i32, %arg1: i32) -> (i32, i32, i32) {
    %c0_i32 = arith.constant 0 : i32
    %c0_i32_0 = arith.constant 0 : i32
    %c0_i32_1 = arith.constant 0 : i32
    return %arg1, %c0_i32, %c0_i32_0 : i32, i32, i32
  }
  func.func @transform_4(%arg0: i32, %arg1: i32) -> (i32, i32, i32) {
    %c0_i32 = arith.constant 0 : i32
    %c0_i32_0 = arith.constant 0 : i32
    %c0_i32_1 = arith.constant 0 : i32
    return %arg1, %c0_i32, %c0_i32_0 : i32, i32, i32
  }
  func.func @transform_5(%arg0: i32, %arg1: i32) -> (i32, i32, i32) {
    %c0_i32 = arith.constant 0 : i32
    %c0_i32_0 = arith.constant 0 : i32
    %c0_i32_1 = arith.constant 0 : i32
    return %arg1, %c0_i32, %c0_i32_0 : i32, i32, i32
  }
  func.func @transform_6(%arg0: i32, %arg1: i32) -> (i32, i32, i32) {
    %c0_i32 = arith.constant 0 : i32
    %c0_i32_0 = arith.constant 0 : i32
    %c0_i32_1 = arith.constant 0 : i32
    return %arg1, %c0_i32, %c0_i32_0 : i32, i32, i32
  }
  func.func @transform_7(%arg0: i32, %arg1: i32) -> (i32, i32, i32) {
    %c0_i32 = arith.constant 0 : i32
    %c0_i32_0 = arith.constant 0 : i32
    %c0_i32_1 = arith.constant 0 : i32
    return %arg1, %c0_i32, %c0_i32_0 : i32, i32, i32
  }
  func.func @transform_8(%arg0: i32, %arg1: i32) -> (i32, i32, i32) {
    %c0_i32 = arith.constant 0 : i32
    %c0_i32_0 = arith.constant 0 : i32
    %c0_i32_1 = arith.constant 0 : i32
    return %arg1, %c0_i32, %c0_i32_0 : i32, i32, i32
  }
  func.func @transform_9(%arg0: i32, %arg1: i32) -> (i32, i32, i32) {
    %c0_i32 = arith.constant 0 : i32
    %c0_i32_0 = arith.constant 0 : i32
    %c0_i32_1 = arith.constant 0 : i32
    return %arg1, %c0_i32, %c0_i32_0 : i32, i32, i32
  }
  func.func @transform_10(%arg0: i32, %arg1: i32) -> (i32, i32, i32) {
    %c0_i32 = arith.constant 0 : i32
    %c0_i32_0 = arith.constant 0 : i32
    %c0_i32_1 = arith.constant 0 : i32
    return %arg1, %c0_i32, %c0_i32_0 : i32, i32, i32
  }
  func.func @transform_11(%arg0: i32, %arg1: i32) -> (i32, i32, i32) {
    %c0_i32 = arith.constant 0 : i32
    %c0_i32_0 = arith.constant 0 : i32
    %c0_i32_1 = arith.constant 0 : i32
    return %arg1, %c0_i32, %c0_i32_0 : i32, i32, i32
  }
  func.func @transform_12(%arg0: i32, %arg1: i32) -> (i32, i32, i32) {
    %c0_i32 = arith.constant 0 : i32
    %c0_i32_0 = arith.constant 0 : i32
    %c0_i32_1 = arith.constant 0 : i32
    return %arg1, %c0_i32, %c0_i32_0 : i32, i32, i32
  }
  func.func @transform_13(%arg0: i32, %arg1: i32) -> (i32, i32) {
    %c0_i32 = arith.constant 0 : i32
    %c0_i32_0 = arith.constant 0 : i32
    %c0_i32_1 = arith.constant 0 : i32
    return %c0_i32, %c0_i32_0 : i32, i32
  }
  func.func @transform_14(%arg0: i32, %arg1: i32) -> (i32, i32) {
    %c0_i32 = arith.constant 0 : i32
    %c0_i32_0 = arith.constant 0 : i32
    %c0_i32_1 = arith.constant 0 : i32
    return %c0_i32, %c0_i32_0 : i32, i32
  }
  func.func @transform_15(%arg0: i32, %arg1: i32) -> (i32, i32) {
    %c0_i32 = arith.constant 0 : i32
    %c0_i32_0 = arith.constant 0 : i32
    return %arg0, %c0_i32 : i32, i32
  }
}

</mosaic_0001>

<bundles_post_ra>
// kernel: model_forward.1
= control target key start
LH: loop header
LB: loop body
LE: loop exit
PB: predicated region body
PF: predicated region fallthrough
CT: control target
= control target key end

     0   :  { %s5925_s0 = inlined_call_operand.vmem [shape: bf16[16,256], index: 0, kind: input, shape index: {}]   ;;  %s5926_s1 = inlined_call_operand.hbm [shape: bf16[2,256,768], index: 1, kind: input, shape index: {}]   ;;  %s5927_s2 = inlined_call_operand.vmem [shape: f32[2,1,768], index: 2, kind: input, shape index: {}]   ;;  %s5928_s3 = inlined_call_operand.hbm [shape: bf16[2,256,256], index: 3, kind: input, shape index: {}]   ;;  %s5929_s4 = inlined_call_operand.vmem [shape: f32[2,1,256], index: 4, kind: input, shape index: {}]   ;;  %s5930_s5 = inlined_call_operand.vmem [shape: f32[2,1,256], index: 5, kind: input, shape index: {}]   ;;  %s5931_s6 = inlined_call_operand.vmem [shape: f32[2,1,256], index: 6, kind: input, shape index: {}]   ;;  %s5932_s7 = inlined_call_operand.hbm [shape: bf16[2,256,512], index: 7, kind: input, shape index: {}]   ;;  %s5933_s8 = inlined_call_operand.vmem [shape: f32[2,1,512], index: 8, kind: input, shape index: {}]   ;;  %s5934_s9 = inlined_call_operand.hbm [shape: bf16[2,512,256], index: 9, kind: input, shape index: {}]   ;;  %s5935_s10 = inlined_call_operand.vmem [shape: f32[2,1,256], index: 10, kind: input, shape index: {}]   ;;  %s5936_s11 = inlined_call_operand.vmem [shape: f32[2,1,256], index: 11, kind: input, shape index: {}]   ;;  %s5937_s12 = inlined_call_operand.vmem [shape: f32[2,1,256], index: 12, kind: input, shape index: {}]   ;;  %s5938_s13 = inlined_call_operand.hbm [shape: bf16[256,512], index: 13, kind: input, shape index: {}]   ;;  %s5939_s14 = inlined_call_operand.vmem [shape: f32[1,512], index: 14, kind: input, shape index: {}]   ;;  %s5940_s15 = inlined_call_operand.vmem [shape: f32[16,512], index: 15, kind: output, shape index: {}]  }
   0x1   :  { %5957 = sst [smem:[#allocation23_spill]] %s5925_s0 }
   0x2   :  { %5958 = sst [smem:[#allocation24_spill]] %s5926_s1 }
   0x3   :  { %5959 = sst [smem:[#allocation25_spill]] %s5927_s2 }
   0x4   :  { %5960 = sst [smem:[#allocation26_spill]] %s5928_s3 }
   0x5   :  { %5961 = sst [smem:[#allocation27_spill]] %s5929_s4 }
   0x6   :  { %5962 = sst [smem:[#allocation28_spill]] %s5930_s5 }
   0x7   :  { %5963 = sst [smem:[#allocation29_spill]] %s5931_s6 }
   0x8   :  { %5964 = sst [smem:[#allocation30_spill]] %s5932_s7 }
   0x9   :  { %5965 = sst [smem:[#allocation31_spill]] %s5933_s8 }
   0xa   :  { %5966 = sst [smem:[#allocation32_spill]] %s5934_s9 }
   0xb   :  { %5967 = sst [smem:[#allocation33_spill]] %s5935_s10 }
   0xc   :  { %5968 = sst [smem:[#allocation34_spill]] %s5936_s11 }
   0xd   :  { %5969 = sst [smem:[#allocation35_spill]] %s5937_s12 }
   0xe   :  { %5970 = sst [smem:[#allocation36_spill]] %s5938_s13 }
   0xf   :  { %5971 = sst [smem:[#allocation37_spill]] %s5939_s14 }
  0x10   :  { %5972 = sst [smem:[#allocation38_spill]] %s5940_s15 }
  0x11   :  { %20 = vsyncpa [#allocation4], 0 }
  0x12   :  { %22 = vsyncpa [#allocation4 + $0x1], 0 }
  0x13   :  { %23 = vsyncpa [#allocation6], 0 }
  0x14   :  { %25 = vsyncpa [#allocation6 + $0x1], 0 }
  0x15   :  { %26 = vsyncpa [#allocation9], 0 }
  0x16   :  { %28 = vsyncpa [#allocation9 + $0x1], 0  ;;  %s5156_s18 = smov 0   ;;  %s5158_s19 = smov 0  }
  0x17   :  { %s5160_s20 = smov 0   ;;  %s5162_s21 = smov 0  }
  0x18   :  { %s5164_s22 = smov 0   ;;  %s5166_s23 = smov 0  }
  0x19   :  { %s5168_s24 = smov 0   ;;  %s5170_s25 = smov 0  }
  0x1a LB: > { %5973 = sst [smem:[#allocation15_spill]] %s5037_s19  ;;  %s5941_s26 = sadd.s32 4294967295, %s5061_s25   ;;  %s5061_s25 = sphi %s5170_s25, %s34_s25   ;;  %s5057_s24 = sphi %s5168_s24, %s6030_s24   ;;  %s5053_s23 = sphi %s5166_s23, %s6029_s23   ;;  %s5049_s22 = sphi %s5164_s22, %s6028_s22   ;;  %s5045_s21 = sphi %s5162_s21, %s6027_s21   ;;  %s5041_s20 = sphi %s5160_s20, %s6026_s20   ;;  %s5037_s19 = sphi %s5158_s19, %s6025_s19   ;;  %s5033_s18 = sphi %s5156_s18, %s6024_s18  }
  0x1b   : > { %5974 = sst [smem:[#allocation16_spill]] %s5041_s20  ;;  %p86_p0 = scmp.ne.s32.totalorder %s5041_s20, %s5037_s19 }
  0x1c   : > { %5975 = sst [smem:[#allocation17_spill]] %s5053_s23  ;;  %p87_p1 = scmp.eq.s32.totalorder %s5061_s25, 0 }
  0x1d   : > { %5976 = sst [smem:[#allocation18_spill]] %s5057_s24  ;;  %p92_p2 = scmp.ne.s32.totalorder %s5037_s19, %s5033_s18 }
  0x1e   : > { %5977 = sst [smem:[#allocation19_spill]] %s5061_s25  ;;  %p5202_p3 = scmp.eq.s32.totalorder %s5941_s26, 0 }
  0x1f   : > { %p5206_p4 = por %p87_p1, %p86_p0  ;;  %p3842_p5 = scmp.ge.s32.totalorder %s5061_s25, 1 }
  0x20   : > { %s5978_s28 = scalar_select %p5202_p3, 1, 0 }
  0x21   : > { %s5979_s29 = scalar_select %p5206_p4, 1, 0 }
  0x22   : > { %p5213_p6 = por %p5202_p3, %p92_p2  ;;  %p457_p7 = scmp.lt.s32.totalorder %s5061_s25, 5 }
  0x23   : > { %s5063_s17 = smov [#allocation10]   ;;  %s43_s27 = sadd.s32 1, %s5053_s23 }
  0x24   : > { %s5980_s30 = scalar_select %p5213_p6, 1, 0 }
  0x25   : > { %p5218_p8 = pnand %p3842_p5, %p457_p7  ;;  %s469_s18 = sshll.u32 %s5063_s17, 4  ;;  %s470_s18 = int_to_ptr.vmem [resolvable:$true] %s469_s18 }
  0x26   : > { %s5983_s13 = sld [smem:[#allocation36_spill]] }
  0x27   : > { %s5981_s16 = scalar_select %p5218_p8, 1, 0 }
  0x28   : > { %p4250_p9 = pneg %p5218_p8 }
  0x2a   : > { %p5226_p10 = pnand %p4250_p9, %p5202_p3 }
  0x2c   : > { %s4835_s12 = scalar_lea.hbm %s5983_s13, 8192  ;;  %p4837_p12 = pneg %p5226_p10 }
  0x2d   : > { %p4836_p11 = scmp.ne.s32.totalorder %s5983_s13, %s4835_s12  ;;  %p4842_p1 = scmp.lt.u32.totalorder %s4835_s12, %s5983_s13 }
  0x2f   : > { %p4838_p13 = pnand %p4837_p12, %p4836_p11 }
  0x31   : > { %p4839_p0 = pneg %p4838_p13 }
  0x33   : > { %p4844_p2 = pnand %p4842_p1, %p4839_p0 }
  0x35   : > { %4847 = shalt.err (!%p4844_p2)
}
  0x36   : > { %s4848_s6 = scalar_lea.vmem %s470_s18, 8192  ;;  %p4856_p3 = scmp.lt.s32.totalorder %s470_s18, %s470_s18 }
  0x37   : > { %p4849_p5 = scmp.ne.s32.totalorder %s470_s18, %s4848_s6  ;;  %p4857_p6 = scmp.lt.s32.totalorder %s4848_s6, %s4848_s6 }
  0x39   : > { %p4851_p7 = pnand %p4849_p5, %p4837_p12  ;;  %p4858_p8 = por %p4857_p6, %p4856_p3 }
  0x3b   : > { %p4852_p9 = pneg %p4851_p7 }
  0x3d   : > { %p4859_p4 = pnand %p4858_p8, %p4852_p9 }
  0x3f   : > { %4862 = shalt.err (!%p4859_p4)
}
  0x40   : > { %s5946_s10 = smov 256   ;;  %s5947_s8 = smov 16  }
  0x41   : > { %4253 = dma.hbm_to_vmem [thread:$0]  (!%p5226_p10), %s5983_s13, 8192, %s470_s18, [#allocation9], %s5946_s10, %s5946_s10, %s5947_s8  }
  0x42   : > { %p44_p3 = scmp.ge.s32.totalorder %s43_s27, 2  ;;  %s46_s12 = sadd.s32 1, %s5057_s24 }
  0x43   : > { %p4268_p4 = scmp.lt.s32.totalorder %s5061_s25, 4  ;;  %s5253_s14 = sand.u32 1, %s5041_s20  }
  0x44   : > { %s6032_s27 = smov (%p44_p3, %s43_s27), 0  ;;  %s6034_s12 = smov (!%p44_p3, %s46_s12), %s5057_s24 }
  0x45   : > { %5984 = sst [smem:[#allocation20_spill]] %s6032_s27  ;;  %s76_s15 = ssub.s32 %s5053_s23, %s6032_s27 }
  0x46   : > { %p5985_p6 = scmp.ne.s32.totalorder %s5979_s29, 0  ;;  %p48_p11 = scmp.ge.s32.totalorder %s6034_s12, 2 }
  0x47   : > { %p77_p10 = scmp.eq.s32.totalorder %s76_s15, 0  ;;  %s5950_s18 = sand.u32 1, %s5061_s25  }
  0x48   : > { %p5262_p8 = pnand %p4268_p4, %p5985_p6  ;;  %s6036_s12 = smov (%p48_p11, %s6034_s12), 0 }
  0x49   : > { %5987 = sst [smem:[#allocation21_spill]] %s6036_s12  ;;  %s5988_s17 = sadd.s32 1, %s5041_s20 }
  0x4a   : > { %s5272_s6 = scalar_select %p77_p10, %s5041_s20, %s5988_s17  }
  0x4b   : > { %s3846_s11 = sshll.u32 %s5253_s14, 8  ;;  %s4197_s10 = sshll.u32 %s5053_s23, 12 }
  0x4c   : > { %5989 = sst [smem:[#allocation22_spill]] %s5272_s6  ;;  %s5990_s3 = sld [smem:[#allocation26_spill]] }
  0x4d   : > { %s526_s29 = scalar_lea.vmem [#allocation5], %s3846_s11  ;;  %s5285_s15 = scalar_lea.sflag [#allocation6], %s5950_s18 }
  0x4e   : > { %s533_s24 = sshll.u32 %s526_s29, 4  ;;  %p5291_p13 = pneg %p5262_p8  ;;  %s5281_s24 = int_to_ptr.vmem [resolvable:$true] %s533_s24 }
  0x52   : > { %s5279_s27 = scalar_lea.hbm %s5990_s3, %s4197_s10  ;;  %s4868_s8 = scalar_lea.hbm %s5990_s3, 8192 }
  0x53   : > { %s4863_s17 = scalar_lea.hbm %s5279_s27, 4096  ;;  %p4869_p2 = scmp.lt.u32.totalorder %s5279_s27, %s5990_s3 }
  0x54   : > { %p4864_p12 = scmp.ne.s32.totalorder %s5279_s27, %s4863_s17  ;;  %p4870_p5 = scmp.lt.u32.totalorder %s4868_s8, %s4863_s17 }
  0x55   : > { %p4872_p9 = scmp.lt.u32.totalorder %s4863_s17, %s5279_s27 }
  0x56   : > { %p4866_p0 = pnand %p5291_p13, %p4864_p12  ;;  %p4871_p7 = por %p4870_p5, %p4869_p2 }
  0x58   : > { %p4867_p1 = pneg %p4866_p0  ;;  %p4873_p3 = por %p4872_p9, %p4871_p7 }
  0x5a   : > { %p4874_p4 = pnand %p4873_p3, %p4867_p1 }
  0x5c   : > { %4877 = shalt.err (!%p4874_p4)
}
  0x5d   : > { %s4878_s18 = scalar_lea.vmem %s5281_s24, 4096  ;;  %s5066_s13 = smov [#allocation5]  }
  0x5e   : > { %p4879_p6 = scmp.ne.s32.totalorder %s5281_s24, %s4878_s18  ;;  %s4883_s10 = sshll.u32 %s5066_s13, 4  ;;  %s4884_s10 = int_to_ptr.vmem [resolvable:$false] %s4883_s10 }
  0x5f   : > { %s4885_s11 = scalar_lea.vmem %s4884_s10, 8192  ;;  %p4886_p12 = scmp.lt.s32.totalorder %s5281_s24, %s4884_s10 }
  0x60   : > { %p4881_p11 = pnand %p4879_p6, %p5291_p13  ;;  %p4887_p0 = scmp.lt.s32.totalorder %s4885_s11, %s4878_s18 }
  0x62   : > { %p4882_p10 = pneg %p4881_p11  ;;  %p4888_p2 = por %p4887_p0, %p4886_p12 }
  0x64   : > { %p4889_p5 = pnand %p4888_p2, %p4882_p10 }
  0x66   : > { %4892 = shalt.err (!%p4889_p5)
}
  0x67   : > { %s5952_s17 = smov 128   ;;  %s5953_s8 = smov 8  }
  0x68   : > { %4260 = dma.hbm_to_vmem [thread:$0]  (!%p5262_p8), %s5279_s27, 4096, %s5281_s24, %s5285_s15, %s5952_s17, %s5952_s17, %s5953_s8  }
  0x69   : > { %s4234_s18 = smul.u32 768, %s5253_s14  ;;  %s5992_s1 = sld [smem:[#allocation24_spill]] }
  0x6a   : > { %s4235_s29 = smul.u32 12288, %s5053_s23  ;;  %s3849_s20 = sshll.u32 %s5253_s14, 9 }
  0x6b   : > { %s498_s3 = scalar_lea.vmem [#allocation3], %s4234_s18  ;;  %s495_s5 = scalar_lea.sflag [#allocation4], %s5253_s14 }
  0x6c   : > { %s505_s6 = sshll.u32 %s498_s3, 4  ;;  %s5325_s6 = int_to_ptr.vmem [resolvable:$true] %s505_s6 }
  0x6f   : > { %s5323_s11 = scalar_lea.hbm %s5992_s1, %s4235_s29  ;;  %s4898_s29 = scalar_lea.hbm %s5992_s1, 24576 }
  0x70   : > { %s4893_s4 = scalar_lea.hbm %s5323_s11, 12288  ;;  %p4899_p3 = scmp.lt.u32.totalorder %s5323_s11, %s5992_s1 }
  0x71   : > { %p4894_p1 = scmp.ne.s32.totalorder %s5323_s11, %s4893_s4  ;;  %p4900_p4 = scmp.lt.u32.totalorder %s4898_s29, %s4893_s4 }
  0x72   : > { %p4902_p11 = scmp.lt.u32.totalorder %s4893_s4, %s5323_s11 }
  0x73   : > { %p4896_p7 = pnand %p4894_p1, %p5291_p13  ;;  %p4901_p6 = por %p4900_p4, %p4899_p3 }
  0x75   : > { %p4897_p9 = pneg %p4896_p7  ;;  %p4903_p10 = por %p4902_p11, %p4901_p6 }
  0x77   : > { %p4904_p12 = pnand %p4903_p10, %p4897_p9 }
  0x79   : > { %4907 = shalt.err (!%p4904_p12)
}
  0x7a   : > { %s4908_s3 = scalar_lea.vmem %s5325_s6, 12288  ;;  %s5069_s18 = smov [#allocation3]  }
  0x7b   : > { %p4909_p0 = scmp.ne.s32.totalorder %s5325_s6, %s4908_s3  ;;  %s4913_s24 = sshll.u32 %s5069_s18, 4  ;;  %s4914_s24 = int_to_ptr.vmem [resolvable:$false] %s4913_s24 }
  0x7c   : > { %s4915_s27 = scalar_lea.vmem %s4914_s24, 24576  ;;  %p4916_p1 = scmp.lt.s32.totalorder %s5325_s6, %s4914_s24 }
  0x7d   : > { %p4911_p2 = pnand %p4909_p0, %p5291_p13  ;;  %p4917_p7 = scmp.lt.s32.totalorder %s4915_s27, %s4908_s3 }
  0x7f   : > { %p4912_p5 = pneg %p4911_p2  ;;  %p4918_p3 = por %p4917_p7, %p4916_p1 }
  0x81   : > { %p4919_p4 = pnand %p4918_p3, %p4912_p5 }
  0x83   : > { %4922 = shalt.err (!%p4919_p4)
}
  0x84   : > { %s5070_s4 = smov 384   ;;  %s5071_s29 = smov 24  }
  0x85   : > { %4257 = dma.hbm_to_vmem [thread:$0]  (!%p5262_p8), %s5323_s11, 12288, %s5325_s6, %s495_s5, %s5070_s4, %s5070_s4, %s5071_s29  }
  0x86   : > { %s4198_s13 = sshll.u32 %s5053_s23, 13  ;;  %s5993_s7 = sld [smem:[#allocation30_spill]] }
  0x87   : > { %s568_s24 = scalar_lea.vmem [#allocation7], %s3849_s20 }
  0x88   : > { %s575_s27 = sshll.u32 %s568_s24, 4  ;;  %s5362_s27 = int_to_ptr.vmem [resolvable:$true] %s575_s27 }
  0x8c   : > { %s5358_s18 = scalar_lea.hbm %s5993_s7, %s4198_s13  ;;  %s4928_s11 = scalar_lea.hbm %s5993_s7, 16384 }
  0x8d   : > { %s4923_s17 = scalar_lea.hbm %s5358_s18, 8192  ;;  %p4929_p10 = scmp.lt.u32.totalorder %s5358_s18, %s5993_s7 }
  0x8e   : > { %p4924_p9 = scmp.ne.s32.totalorder %s5358_s18, %s4923_s17  ;;  %p4930_p12 = scmp.lt.u32.totalorder %s4928_s11, %s4923_s17 }
  0x8f   : > { %p4932_p2 = scmp.lt.u32.totalorder %s4923_s17, %s5358_s18 }
  0x90   : > { %p4926_p6 = pnand %p4924_p9, %p5291_p13  ;;  %p4931_p0 = por %p4930_p12, %p4929_p10 }
  0x92   : > { %p4927_p11 = pneg %p4926_p6  ;;  %p4933_p5 = por %p4932_p2, %p4931_p0 }
  0x94   : > { %p4934_p1 = pnand %p4933_p5, %p4927_p11 }
  0x96   : > { %4937 = shalt.err (!%p4934_p1)
}
  0x97   : > { %s4938_s10 = scalar_lea.vmem %s5362_s27, 8192  ;;  %s5072_s3 = smov [#allocation7]  }
  0x98   : > { %p4939_p7 = scmp.ne.s32.totalorder %s5362_s27, %s4938_s10  ;;  %s4943_s24 = sshll.u32 %s5072_s3, 4  ;;  %s4944_s24 = int_to_ptr.vmem [resolvable:$false] %s4943_s24 }
  0x99   : > { %s4945_s5 = scalar_lea.vmem %s4944_s24, 16384  ;;  %p4946_p9 = scmp.lt.s32.totalorder %s5362_s27, %s4944_s24 }
  0x9a   : > { %p4941_p3 = pnand %p4939_p7, %p5291_p13  ;;  %p4947_p6 = scmp.lt.s32.totalorder %s4945_s5, %s4938_s10 }
  0x9c   : > { %p4942_p4 = pneg %p4941_p3  ;;  %p4948_p10 = por %p4947_p6, %p4946_p9 }
  0x9e   : > { %p4949_p12 = pnand %p4948_p10, %p4942_p4 }
  0xa0   : > { %4952 = shalt.err (!%p4949_p12)
}
  0xa1   : > { %s5994_s17 = smov 16   ;;  %s5995_s6 = smov 256  }
  0xa2   : > { %4263 = dma.hbm_to_vmem [thread:$0]  (!%p5262_p8), %s5358_s18, 8192, %s5362_s27, %s5285_s15, %s5995_s6, %s5995_s6, %s5994_s17  }
  0xa3   : > { %s5996_s9 = sld [smem:[#allocation32_spill]]  ;;  %s596_s10 = scalar_lea.vmem [#allocation8], %s3849_s20 }
  0xa4   : > { %s603_s3 = sshll.u32 %s596_s10, 4  ;;  %s5997_s24 = sand.u32 1, %s5061_s25   ;;  %s5398_s3 = int_to_ptr.vmem [resolvable:$true] %s603_s3 }
  0xa5   : > { %s5402_s5 = scalar_lea.sflag [#allocation9], %s5997_s24 }
  0xa9   : > { %s5394_s29 = scalar_lea.hbm %s5996_s9, %s4198_s13  ;;  %s4958_s14 = scalar_lea.hbm %s5996_s9, 16384 }
  0xaa   : > { %s4953_s8 = scalar_lea.hbm %s5394_s29, 8192  ;;  %p4959_p5 = scmp.lt.u32.totalorder %s5394_s29, %s5996_s9 }
  0xab   : > { %p4954_p11 = scmp.ne.s32.totalorder %s5394_s29, %s4953_s8  ;;  %p4960_p1 = scmp.lt.u32.totalorder %s4958_s14, %s4953_s8 }
  0xac   : > { %p4962_p3 = scmp.lt.u32.totalorder %s4953_s8, %s5394_s29 }
  0xad   : > { %p4956_p0 = pnand %p4954_p11, %p5291_p13  ;;  %p4961_p7 = por %p4960_p1, %p4959_p5 }
  0xaf   : > { %p4957_p2 = pneg %p4956_p0  ;;  %p4963_p4 = por %p4962_p3, %p4961_p7 }
  0xb1   : > { %p4964_p9 = pnand %p4963_p4, %p4957_p2 }
  0xb3   : > { %4967 = shalt.err (!%p4964_p9)
}
  0xb4   : > { %s4968_s20 = scalar_lea.vmem %s5398_s3, 8192  ;;  %s5073_s17 = smov [#allocation8]  }
  0xb5   : > { %p4969_p6 = scmp.ne.s32.totalorder %s5398_s3, %s4968_s20  ;;  %s4973_s6 = sshll.u32 %s5073_s17, 4  ;;  %s4974_s6 = int_to_ptr.vmem [resolvable:$false] %s4973_s6 }
  0xb6   : > { %s4975_s11 = scalar_lea.vmem %s4974_s6, 16384  ;;  %p4976_p11 = scmp.lt.s32.totalorder %s5398_s3, %s4974_s6 }
  0xb7   : > { %p4971_p10 = pnand %p4969_p6, %p5291_p13  ;;  %p4977_p0 = scmp.lt.s32.totalorder %s4975_s11, %s4968_s20 }
  0xb9   : > { %p4972_p12 = pneg %p4971_p10  ;;  %p4978_p5 = por %p4977_p0, %p4976_p11 }
  0xbb   : > { %p4979_p1 = pnand %p4978_p5, %p4972_p12 }
  0xbd   : > { %4982 = shalt.err (!%p4979_p1)
}
  0xbe   : > { %s5998_s8 = smov 8   ;;  %s5999_s4 = smov 128  }
  0xbf   : > { %4266 = dma.hbm_to_vmem [thread:$0]  (!%p5262_p8), %s5394_s29, 8192, %s5398_s3, %s5402_s5, %s5999_s4, %s5999_s4, %s5998_s8  }
  0xc0   : > { %p6000_p13 = scmp.ne.s32.totalorder %s5981_s16, 0 }
  0xc1   : > { %s638_s12 = sand.u32 (!%p6000_p13), 1, %s5037_s19   ;;  %p6001_p2 = scmp.ne.s32.totalorder (!%p6000_p13), %s5980_s30, 0 }
  0xc2   : > { %636 = sbr.rel (%p6000_p13) target bundleno = 2797 (0xaed), region = 80  ;;  %s639_s24 = scalar_lea.sflag (!%p6000_p13), [#allocation4], %s638_s12 }
  0xc3   : > { %s4236_s10 = smul.u32 (!%p6000_p13), 768, %s638_s12 }
  0xc5   : > { %s5432_s15 = scalar_lea.vmem (!%p6000_p13), [#allocation3], %s4236_s10 }
  0xc9   : > { %5016 = dma.done.wait (%p6001_p2), %s639_s24, 12288  }
  0xca   : > { %5018 = vsyncadd (%p6001_p2), %s639_s24, 4294955008  ;;  %s6002_s26 = sadd.s32 4294967295, %s5061_s25   ;;  %s3856_s29 = sshll.u32 %s638_s12, 8 }
  0xcb   : > { %s647_s13 = sand.u32 1, %s6002_s26   ;;  %s5440_s16 = scalar_lea.vmem [#allocation5], %s3856_s29 }
  0xcc   : > { %s648_s3 = scalar_lea.sflag [#allocation6], %s647_s13 }
  0xcd   : > { %5020 = dma.done.wait (%p6001_p2), %s648_s3, 12288  }
  0xce   : > { %5022 = vsyncadd (%p6001_p2), %s648_s3, 4294955008  ;;  %s3857_s5 = sshll.u32 %s638_s12, 9  ;;  %s666_s18 = scalar_lea.sflag [#allocation9], %s647_s13 }
  0xcf   : > { %s5446_s14 = scalar_lea.vmem [#allocation7], %s3857_s5  ;;  %s5448_s27 = scalar_lea.vmem [#allocation8], %s3857_s5 }
  0xd0   : > { %5024 = dma.done.wait (%p6001_p2), %s666_s18, 8192  }
  0xd1   : > { %5026 = vsyncadd (%p6001_p2), %s666_s18, 4294959104  ;;  %p6003_p8 = scmp.ne.s32.totalorder %s5978_s28, 0 }
  0xd3   : > { %5028 = dma.done.wait (%p6003_p8), [#allocation9], 8192  }
  0xd4   : > { %5030 = vsyncadd (%p6003_p8), [#allocation9], 4294959104  ;;  %p772_p7 = scmp.lt.s32.totalorder %s5049_s22, 1  ;;  %p777_p3 = scmp.lt.s32.totalorder %s5045_s21, 1 }
  0xd5   : > { %s6004_s0 = sld [smem:[#allocation23_spill]]  ;;  %s6005_s2 = sld [smem:[#allocation25_spill]] }
  0xd6   : > { %s6038_s22 = smov (!%p772_p7, %s5049_s22), 1  ;;  %s6008_s1 = sld [smem:[#allocation29_spill]] }
  0xd7   : > { %s778_s20 = scalar_select %p777_p3, %s5045_s21, 1 }
  0xd8   : > { %s4200_s17 = sshll.u32 %s6038_s22, 3  ;;  %s4201_s6 = sshll.u32 %s6038_s22, 5 }
  0xd9   : > { %s4237_s4 = smul.u32 6, %s778_s20  ;;  %s5465_s12 = sshll.u32 %s778_s20, 1 }
  0xda   : > { %s3865_s28 = sshll.u32 %s778_s20, 2  ;;  %s6009_s20 = sld [smem:[#allocation31_spill]] }
  0xdb   : > { %s776_s30 = scalar_lea.vmem %s6004_s0, %s4200_s17  ;;  %s5470_s26 = scalar_lea.vmem %s6005_s2, %s4237_s4 }
  0xdc   : > { %s792_s7 = scalar_lea.vmem %s6008_s1, %s5465_s12  ;;  %s6010_s24 = sld [smem:[#allocation33_spill]] }
  0xdd   : > { %s6011_s13 = sld [smem:[#allocation34_spill]]  ;;  %s6012_s18 = sld [smem:[#allocation35_spill]] }
  0xde   : > { %s6013_s1 = sld [smem:[#allocation38_spill]]  ;;  %p3871_p4 = scmp.ne.s32.totalorder %s5045_s21, 0 }
  0xdf   : > { %v819_v0 = vld [vmem:[%s776_s30] sm:$0xff] (!%p3871_p4) }
  0xe0   : > { %s5487_s19 = scalar_lea.vmem %s6009_s20, %s3865_s28  ;;  %818 = sbr.rel (%p3871_p4) target bundleno = 231 (0xe7), region = 104  ;;  %v820_v1 = vunpack.c.l.bf16 (!%p3871_p4), %v819_v0  ;;  %v821_v2 = vunpack.c.h.bf16 (!%p3871_p4), %v819_v0 }
  0xe2   : > { %s800_s2 = scalar_lea.vmem %s6010_s24, %s5465_s12  ;;  %822 = vst [vmem:[#allocation2] sm:$0xff] (!%p3871_p4), %v820_v1  ;;  %823 = vst [vmem:[#allocation2 + $0x8] sm:$0xff] (!%p3871_p4), %v821_v2 }
  0xe3   : > { %s804_s29 = scalar_lea.vmem %s6011_s13, %s5465_s12  ;;  %s808_s17 = scalar_lea.vmem %s6012_s18, %s5465_s12 }
  0xe4   : > { %s5504_s8 = scalar_lea.vmem %s6013_s1, %s4201_s6 }
  0xe7 PF: > { %v4343_v3 = vld [vmem:[%s5432_s15 + $0xc] ss:$24 sps:$4 sm:$0xff]   ;;  %v4345_v4 = vld [vmem:[%s5432_s15 + $0x8] ss:$24 sps:$4 sm:$0xff]   ;;  %v4346_v5 = vld [vmem:[%s5432_s15 + $0x3c] ss:$24 sps:$4 sm:$0xff]  }
  0xe8   : > { %1477 = vmatprep.subr.bf16.mxu1 %v4343_v3  ;;  %v4348_v6 = vld [vmem:[%s5432_s15 + $0x4] ss:$24 sps:$4 sm:$0xff]   ;;  %v4350_v7 = vld [vmem:[%s5432_s15 + $0x38] ss:$24 sps:$4 sm:$0xff]   ;;  %v4354_v10 = vld [vmem:[%s5432_s15 + $0x34] ss:$24 sps:$4 sm:$0xff]  }
  0xe9   : > { %1478 = vmatpush1.bf16.msra.mxu1 %v4345_v4  ;;  %v4351_v8 = vld [vmem:[%s5432_s15] ss:$24 sps:$4 sm:$0xff]   ;;  %v4352_v9 = vld [vmem:[%s5432_s15 + $0x6c] ss:$24 sps:$4 sm:$0xff]   ;;  %1436 = vmatprep.subr.bf16.mxu0 %v4348_v6  ;;  %v4357_v11 = vld [vmem:[%s5432_s15 + $0x30] ss:$24 sps:$4 sm:$0xff]  }
  0xea   : > { %1479 = vmatprep.subr.bf16.mxu1 %v4346_v5  ;;  %1437 = vmatpush1.bf16.msra.mxu0 %v4351_v8  ;;  %v4356_v12 = vld [vmem:[%s5432_s15 + $0x68] ss:$24 sps:$4 sm:$0xff]   ;;  %v4358_v13 = vld [vmem:[%s5432_s15 + $0x9c] ss:$24 sps:$4 sm:$0xff]   ;;  %v4362_v16 = vld [vmem:[%s5432_s15 + $0x98] ss:$24 sps:$4 sm:$0xff]  }
  0xeb   : > { %1438 = vmatprep.subr.bf16.mxu0 %v4354_v10  ;;  %v4360_v14 = vld [vmem:[%s5432_s15 + $0x64] ss:$24 sps:$4 sm:$0xff]   ;;  %v4363_v15 = vld [vmem:[%s5432_s15 + $0x60] ss:$24 sps:$4 sm:$0xff]   ;;  %v4366_v17 = vld [vmem:[%s5432_s15 + $0x94] ss:$24 sps:$4 sm:$0xff]  }
  0xec   : > { %v4364_v18 = vld [vmem:[%s5432_s15 + $0xcc] ss:$24 sps:$4 sm:$0xff]   ;;  %v4368_v19 = vld [vmem:[%s5432_s15 + $0xc8] ss:$24 sps:$4 sm:$0xff]   ;;  %v4370_v22 = vld [vmem:[%s5432_s15 + $0xfc] ss:$24 sps:$4 sm:$0xff]  }
  0xed   : > { %1480 = vmatpush1.bf16.msra.mxu1 %v4350_v7  ;;  %v4369_v20 = vld [vmem:[%s5432_s15 + $0x90] ss:$24 sps:$4 sm:$0xff]   ;;  %v4372_v21 = vld [vmem:[%s5432_s15 + $0xc4] ss:$24 sps:$4 sm:$0xff]   ;;  %v4375_v23 = vld [vmem:[%s5432_s15 + $0xc0] ss:$24 sps:$4 sm:$0xff]  }
  0xee   : > { %1481 = vmatprep.subr.bf16.mxu1 %v4352_v9  ;;  %1439 = vmatpush1.bf16.msra.mxu0 %v4357_v11  ;;  %v4374_v24 = vld [vmem:[%s5432_s15 + $0xf8] ss:$24 sps:$4 sm:$0xff]   ;;  %v4378_v25 = vld [vmem:[%s5432_s15 + $0xf4] ss:$24 sps:$4 sm:$0xff]   ;;  %v4380_v27 = vld [vmem:[%s5432_s15 + $0x128] ss:$24 sps:$4 sm:$0xff]  }
  0xef   : > { %1440 = vmatprep.subr.bf16.mxu0 %v4360_v14  ;;  %v4376_v26 = vld [vmem:[%s5432_s15 + $0x12c] ss:$24 sps:$4 sm:$0xff]   ;;  %v4381_v28 = vld [vmem:[%s5432_s15 + $0xf0] ss:$24 sps:$4 sm:$0xff]   ;;  %v4382_v30 = vld [vmem:[%s5432_s15 + $0x15c] ss:$24 sps:$4 sm:$0xff]  }
  0xf0   : > { %v4384_v29 = vld [vmem:[%s5432_s15 + $0x124] ss:$24 sps:$4 sm:$0xff]   ;;  %v4387_v31 = vld [vmem:[%s5432_s15 + $0x120] ss:$24 sps:$4 sm:$0xff]   ;;  %v4390_v33 = vld [vmem:[%s5432_s15 + $0x154] ss:$24 sps:$4 sm:$0xff]  }
  0xf1   : > { %1482 = vmatpush1.bf16.msra.mxu1 %v4356_v12  ;;  %v4386_v32 = vld [vmem:[%s5432_s15 + $0x158] ss:$24 sps:$4 sm:$0xff]   ;;  %v4388_v34 = vld [vmem:[%s5432_s15 + $0x18c] ss:$24 sps:$4 sm:$0xff]   ;;  %v4392_v35 = vld [vmem:[%s5432_s15 + $0x188] ss:$24 sps:$4 sm:$0xff]  }
  0xf2   : > { %1483 = vmatprep.subr.bf16.mxu1 %v4358_v13  ;;  %1441 = vmatpush1.bf16.msra.mxu0 %v4363_v15  ;;  %v4393_v36 = vld [vmem:[%s5432_s15 + $0x150] ss:$24 sps:$4 sm:$0xff]   ;;  %v4396_v37 = vld [vmem:[%s5432_s15 + $0x184] ss:$24 sps:$4 sm:$0xff]   ;;  %v4399_v39 = vld [vmem:[%s5432_s15 + $0x180] ss:$24 sps:$4 sm:$0xff]  }
  0xf3   : > { %1442 = vmatprep.subr.bf16.mxu0 %v4366_v17  ;;  %v4394_v38 = vld [vmem:[%s5432_s15 + $0x1bc] ss:$24 sps:$4 sm:$0xff]   ;;  %v4398_v40 = vld [vmem:[%s5432_s15 + $0x1b8] ss:$24 sps:$4 sm:$0xff]   ;;  %v4400_v42 = vld [vmem:[%s5432_s15 + $0x1ec] ss:$24 sps:$4 sm:$0xff]  }
  0xf4   : > { %v4402_v41 = vld [vmem:[%s5432_s15 + $0x1b4] ss:$24 sps:$4 sm:$0xff]   ;;  %v4404_v43 = vld [vmem:[%s5432_s15 + $0x1e8] ss:$24 sps:$4 sm:$0xff]   ;;  %v4408_v45 = vld [vmem:[%s5432_s15 + $0x1e4] ss:$24 sps:$4 sm:$0xff]  }
  0xf5   : > { %1484 = vmatpush1.bf16.msra.mxu1 %v4362_v16  ;;  %v4405_v44 = vld [vmem:[%s5432_s15 + $0x1b0] ss:$24 sps:$4 sm:$0xff]   ;;  %v4406_v46 = vld [vmem:[%s5432_s15 + $0x21c] ss:$24 sps:$4 sm:$0xff]   ;;  %v4411_v49 = vld [vmem:[%s5432_s15 + $0x1e0] ss:$24 sps:$4 sm:$0xff]  }
  0xf6   : > { %1485 = vmatprep.subr.bf16.mxu1 %v4364_v18  ;;  %1443 = vmatpush1.bf16.msra.mxu0 %v4369_v20  ;;  %v4410_v47 = vld [vmem:[%s5432_s15 + $0x218] ss:$24 sps:$4 sm:$0xff]   ;;  %v4414_v51 = vld [vmem:[%s5432_s15 + $0x214] ss:$24 sps:$4 sm:$0xff]   ;;  %v4416_v53 = vld [vmem:[%s5432_s15 + $0x248] ss:$24 sps:$4 sm:$0xff]  }
  0xf7   : > { %1444 = vmatprep.subr.bf16.mxu0 %v4372_v21  ;;  %v5552_v48 = vld [vmem:[#allocation2 + $0x8] sm:$0xff]  ;;  %v4412_v52 = vld [vmem:[%s5432_s15 + $0x24c] ss:$24 sps:$4 sm:$0xff]   ;;  %v4417_v54 = vld [vmem:[%s5432_s15 + $0x210] ss:$24 sps:$4 sm:$0xff]   ;;  %vm5075_vm0 = vmmov 0  }
  0xf8   : > { %v827_v50 = vpack.c.bf16 %v5552_v48, %v5552_v48  ;;  %v4420_v55 = vld [vmem:[%s5432_s15 + $0x244] ss:$24 sps:$4 sm:$0xff]   ;;  %v4422_v57 = vld [vmem:[%s5432_s15 + $0x278] ss:$24 sps:$4 sm:$0xff]   ;;  %v4426_v59 = vld [vmem:[%s5432_s15 + $0x274] ss:$24 sps:$4 sm:$0xff]  }
  0xf9   : > { %1486 = vmatpush1.bf16.msra.mxu1 %v4368_v19  ;;  %v4418_v56 = vld [vmem:[%s5432_s15 + $0x27c] ss:$24 sps:$4 sm:$0xff]   ;;  %v4423_v58 = vld [vmem:[%s5432_s15 + $0x240] ss:$24 sps:$4 sm:$0xff]   ;;  %v4424_v60 = vld [vmem:[%s5432_s15 + $0x2ac] ss:$24 sps:$4 sm:$0xff]  }
  0xfa   : > { %1487 = vmatprep.subr.bf16.mxu1 %v4370_v22  ;;  %1445 = vmatpush1.bf16.msra.mxu0 %v4375_v23  ;;  %v4428_v61 = vld [vmem:[%s5432_s15 + $0x2a8] ss:$24 sps:$4 sm:$0xff]   ;;  %v4432_v63 = vld [vmem:[%s5432_s15 + $0x2a4] ss:$24 sps:$4 sm:$0xff]   ;;  %v4434_v1 = vld [vmem:[%s5432_s15 + $0x2d8] ss:$24 sps:$4 sm:$0xff]  }
  0xfb   : > { %1446 = vmatprep.subr.bf16.mxu0 %v4378_v25  ;;  %1509 = vmatprep.mubr.bf16.mxu1 %v827_v50  ;;  %v4429_v62 = vld [vmem:[%s5432_s15 + $0x270] ss:$24 sps:$4 sm:$0xff]   ;;  %v4430_v0 = vld [vmem:[%s5432_s15 + $0x2dc] ss:$24 sps:$4 sm:$0xff]   ;;  %v4435_v2 = vld [vmem:[%s5432_s15 + $0x2a0] ss:$24 sps:$4 sm:$0xff]  }
  0xfc   : > { %1468 = vmatprep.mubr.bf16.mxu0 %v827_v50  ;;  %v5573_v3 = vld [vmem:[#allocation2] sm:$0xff]  ;;  %v4444_v9 = vld [vmem:[%s5432_s15 + $0x44] ss:$24 sps:$4 sm:$0xff]   ;;  %v4442_v10 = vld [vmem:[%s5432_s15 + $0x40] ss:$24 sps:$4 sm:$0xff]   ;;  %vm1673_vm1 = vcmask 1043456  }
  0xfd   : > { %1488 = vmatpush1.bf16.msra.mxu1 %v4374_v24  ;;  %v4436_v4 = vld [vmem:[%s5432_s15 + $0x2d4] ss:$24 sps:$4 sm:$0xff]   ;;  %v5578_v5 = vpack.c.bf16 %v5573_v3, %v5573_v3  ;;  %v4438_v6 = vld [vmem:[%s5432_s15 + $0x2d0] ss:$24 sps:$4 sm:$0xff]   ;;  %v4450_v13 = vld [vmem:[%s5432_s15 + $0xa4] ss:$24 sps:$4 sm:$0xff]  }
  0xfe   : > { %1489 = vmatprep.subr.bf16.mxu1 %v4376_v26  ;;  %1447 = vmatpush1.bf16.msra.mxu0 %v4381_v28  ;;  %v4441_v7 = vld [vmem:[%s5432_s15 + $0x14] ss:$24 sps:$4 sm:$0xff]   ;;  %v4439_v8 = vld [vmem:[%s5432_s15 + $0x10] ss:$24 sps:$4 sm:$0xff]   ;;  %v4448_v14 = vld [vmem:[%s5432_s15 + $0xa0] ss:$24 sps:$4 sm:$0xff]  }
  0xff   : > { %1448 = vmatprep.subr.bf16.mxu0 %v4384_v29  ;;  %v4447_v11 = vld [vmem:[%s5432_s15 + $0x74] ss:$24 sps:$4 sm:$0xff]   ;;  %v4445_v12 = vld [vmem:[%s5432_s15 + $0x70] ss:$24 sps:$4 sm:$0xff]   ;;  %v4456_v17 = vld [vmem:[%s5432_s15 + $0x104] ss:$24 sps:$4 sm:$0xff]  }
 0x100   : > { %v4453_v15 = vld [vmem:[%s5432_s15 + $0xd4] ss:$24 sps:$4 sm:$0xff]   ;;  %v4451_v16 = vld [vmem:[%s5432_s15 + $0xd0] ss:$24 sps:$4 sm:$0xff]   ;;  %v4454_v18 = vld [vmem:[%s5432_s15 + $0x100] ss:$24 sps:$4 sm:$0xff]  }
 0x101   : > { %1490 = vmatpush1.bf16.msra.mxu1 %v4380_v27  ;;  %v4459_v19 = vld [vmem:[%s5432_s15 + $0x134] ss:$24 sps:$4 sm:$0xff]   ;;  %v4457_v20 = vld [vmem:[%s5432_s15 + $0x130] ss:$24 sps:$4 sm:$0xff]   ;;  %v4462_v21 = vld [vmem:[%s5432_s15 + $0x164] ss:$24 sps:$4 sm:$0xff]  }
 0x102   : > { %1491 = vmatprep.subr.bf16.mxu1 %v4382_v30  ;;  %1449 = vmatpush1.bf16.msra.mxu0 %v4387_v31  ;;  %v4460_v22 = vld [vmem:[%s5432_s15 + $0x160] ss:$24 sps:$4 sm:$0xff]   ;;  %v4465_v23 = vld [vmem:[%s5432_s15 + $0x194] ss:$24 sps:$4 sm:$0xff]   ;;  %v4463_v24 = vld [vmem:[%s5432_s15 + $0x190] ss:$24 sps:$4 sm:$0xff]  }
 0x103   : > { %1450 = vmatprep.subr.bf16.mxu0 %v4390_v33  ;;  %v4468_v25 = vld [vmem:[%s5432_s15 + $0x1c4] ss:$24 sps:$4 sm:$0xff]   ;;  %v4466_v26 = vld [vmem:[%s5432_s15 + $0x1c0] ss:$24 sps:$4 sm:$0xff]   ;;  %v4471_v27 = vld [vmem:[%s5432_s15 + $0x1f4] ss:$24 sps:$4 sm:$0xff]  }
 0x104   : > { %v4469_v28 = vld [vmem:[%s5432_s15 + $0x1f0] ss:$24 sps:$4 sm:$0xff]   ;;  %v4474_v29 = vld [vmem:[%s5432_s15 + $0x224] ss:$24 sps:$4 sm:$0xff]   ;;  %v4472_v30 = vld [vmem:[%s5432_s15 + $0x220] ss:$24 sps:$4 sm:$0xff]  }
 0x105   : > { %1492 = vmatpush1.bf16.msra.mxu1 %v4386_v32  ;;  %v4477_v31 = vld [vmem:[%s5432_s15 + $0x254] ss:$24 sps:$4 sm:$0xff]   ;;  %v4475_v32 = vld [vmem:[%s5432_s15 + $0x250] ss:$24 sps:$4 sm:$0xff]   ;;  %v4480_v33 = vld [vmem:[%s5432_s15 + $0x284] ss:$24 sps:$4 sm:$0xff]  }
 0x106   : > { %1493 = vmatprep.subr.bf16.mxu1 %v4388_v34  ;;  %1451 = vmatpush1.bf16.msra.mxu0 %v4393_v36  ;;  %v4478_v34 = vld [vmem:[%s5432_s15 + $0x280] ss:$24 sps:$4 sm:$0xff]   ;;  %v4481_v36 = vld [vmem:[%s5432_s15 + $0x2b0] ss:$24 sps:$4 sm:$0xff]   ;;  %vm1645_vm2 = vcmask 64512   ;;  %s6014_s25 = sld [smem:[#allocation27_spill]] }
 0x107   : > { %1452 = vmatprep.subr.bf16.mxu0 %v4396_v37  ;;  %v4486_v37 = vld [vmem:[%s5432_s15 + $0x2e4] ss:$24 sps:$4 sm:$0xff]   ;;  %s6016_s30 = sld [smem:[#allocation28_spill]]  ;;  %p4130_p9 = scmp.ne.s32.totalorder %s5045_s21, 1 }
 0x108   : > { %s6022_s22 = sld [smem:[#allocation37_spill]] (!%p4130_p9) }
 0x109   : > { %1494 = vmatpush1.bf16.msra.mxu1 %v4392_v35  ;;  %v4483_v35 = vld [vmem:[%s5432_s15 + $0x2b4] ss:$24 sps:$4 sm:$0xff]  }
 0x10a   : > { %1495 = vmatprep.subr.bf16.mxu1 %v4394_v38  ;;  %1453 = vmatpush1.bf16.msra.mxu0 %v4399_v39  ;;  %v4484_v38 = vld [vmem:[%s5432_s15 + $0x2e0] ss:$24 sps:$4 sm:$0xff]   ;;  %v5074_v39 = vmov 0.0  }
 0x10b   : > { %1454 = vmatprep.subr.bf16.mxu0 %v4402_v41 }
 0x10c   : > { %s6015_s15 = scalar_lea.vmem %s6014_s25, %s5465_s12 }
 0x10d   : > { %1496 = vmatpush1.bf16.msra.mxu1 %v4398_v40  ;;  %v926_v40 = vlaneseq  ;;  %s6017_s28 = scalar_lea.vmem %s6016_s30, %s5465_s12 }
 0x10e   : > { %1497 = vmatprep.subr.bf16.mxu1 %v4400_v42  ;;  %1455 = vmatpush1.bf16.msra.mxu0 %v4405_v44 }
 0x10f   : > { %1456 = vmatprep.subr.bf16.mxu0 %v4408_v45  ;;  %v927_v41 = vshrl.u32 %v926_v40, 7 }
 0x111   : > { %1498 = vmatpush1.bf16.msra.mxu1 %v4404_v43  ;;  %v5622_v42 = vsub.s32 2, %v927_v41  ;;  %v924_v43 = vld [vmem:[%s5470_s26] sm:$0x3f]  ;;  %v5625_v44 = vsub.s32 0, %v927_v41 }
 0x112   : > { %1499 = vmatprep.subr.bf16.mxu1 %v4406_v46  ;;  %1457 = vmatpush1.bf16.msra.mxu0 %v4411_v49  ;;  %v5628_v46 = vsub.s32 3, %v927_v41 }
 0x113   : > { %1458 = vmatprep.subr.bf16.mxu0 %v4414_v51  ;;  %v937_v45 = vrot.slane %v924_v43, %v5622_v42  ;;  %v929_v49 = vrot.slane %v924_v43, %v5625_v44 }
 0x115   : > { %1500 = vmatpush1.bf16.msra.mxu1 %v4410_v47 }
 0x116   : > { %1501 = vmatprep.subr.bf16.mxu1 %v4412_v52  ;;  %1459 = vmatpush1.bf16.msra.mxu0 %v4417_v54  ;;  %v941_v54 = vrot.slane %v924_v43, %v5628_v46 }
 0x117   : > { %1460 = vmatprep.subr.bf16.mxu0 %v4420_v55 }
 0x119   : > { %1502 = vmatpush1.bf16.msra.mxu1 %v4416_v53 }
 0x11a   : > { %1503 = vmatprep.subr.bf16.mxu1 %v4418_v56  ;;  %1461 = vmatpush1.bf16.msra.mxu0 %v4423_v58 }
 0x11b   : > { %1462 = vmatprep.subr.bf16.mxu0 %v4426_v59 }
 0x11d   : > { %1504 = vmatpush1.bf16.msra.mxu1 %v4422_v57 }
 0x11e   : > { %1505 = vmatprep.subr.bf16.mxu1 %v4424_v60  ;;  %1463 = vmatpush1.bf16.msra.mxu0 %v4429_v62  ;;  %v5632_v60 = vsub.s32 1, %v927_v41 }
 0x11f   : > { %1464 = vmatprep.subr.bf16.mxu0 %v4432_v63 }
 0x121   : > { %1506 = vmatpush1.bf16.msra.mxu1 %v4428_v61 }
 0x122   : > { %1507 = vmatprep.subr.bf16.mxu1 %v4430_v0  ;;  %1465 = vmatpush1.bf16.msra.mxu0 %v4435_v2  ;;  %v933_v0 = vrot.slane %v924_v43, %v5632_v60 }
 0x123   : > { %1466 = vmatprep.subr.bf16.mxu0 %v4436_v4 }
 0x125   : > { %1508 = vmatpush1.bf16.msra.mxu1 %v4434_v1 }
 0x126   : > { %1467 = vmatpush1.bf16.msra.mxu0 %v4438_v6  ;;  %4222 = vmatprep.subr.bf16.mxu1 %v5074_v39  ;;  %v948_v6 = vsub.s32 5, %v927_v41 }
 0x127   : > { %1518 = vmatprep.subr.bf16.mxu0 %v4441_v7 }
 0x128   : > { %1510 = vmatmul.mubr.bf16.vlgmr.msra.gmra.mrb[0].mxu1 %v5578_v5 }
 0x129   : > { %1469 = vmatmul.mubr.bf16.vlgmr.msra.gmra.mrb[0].mxu0 %v5578_v5  ;;  %4224 = vmatprep.mubr.msk.bf16.mxu1 %vm5075_vm0, %v5074_v39 }
 0x12a   : > { %1519 = vmatpush1.bf16.msra.mxu0 %v4439_v8  ;;  %1550 = vmatprep.mubr.bf16.mxu0 %v827_v50  ;;  %v949_v8 = vrot.slane %v924_v43, %v948_v6  ;;  %v4511_v6 = vld [vmem:[%s5440_s16 + $0x80] ss:$8 sps:$4 sm:$0xff]  }
 0x12b   : > { %1520 = vmatprep.subr.bf16.mxu0 %v4444_v9 }
 0x12e   : > { %1521 = vmatpush1.bf16.msra.mxu0 %v4442_v10 }
 0x12f   : > { %1522 = vmatprep.subr.bf16.mxu0 %v4447_v11 }
 0x132   : > { %1523 = vmatpush1.bf16.msra.mxu0 %v4445_v12 }
 0x133   : > { %1524 = vmatprep.subr.bf16.mxu0 %v4450_v13 }
 0x136   : > { %1525 = vmatpush1.bf16.msra.mxu0 %v4448_v14 }
 0x137   : > { %1526 = vmatprep.subr.bf16.mxu0 %v4453_v15 }
 0x13a   : > { %1527 = vmatpush1.bf16.msra.mxu0 %v4451_v16 }
 0x13b   : > { %1528 = vmatprep.subr.bf16.mxu0 %v4456_v17 }
 0x13e   : > { %1529 = vmatpush1.bf16.msra.mxu0 %v4454_v18 }
 0x13f   : > { %1530 = vmatprep.subr.bf16.mxu0 %v4459_v19 }
 0x142   : > { %1531 = vmatpush1.bf16.msra.mxu0 %v4457_v20 }
 0x143   : > { %1532 = vmatprep.subr.bf16.mxu0 %v4462_v21 }
 0x146   : > { %1533 = vmatpush1.bf16.msra.mxu0 %v4460_v22 }
 0x147   : > { %1534 = vmatprep.subr.bf16.mxu0 %v4465_v23 }
 0x14a   : > { %1535 = vmatpush1.bf16.msra.mxu0 %v4463_v24 }
 0x14b   : > { %1536 = vmatprep.subr.bf16.mxu0 %v4468_v25 }
 0x14e   : > { %1537 = vmatpush1.bf16.msra.mxu0 %v4466_v26 }
 0x14f   : > { %1538 = vmatprep.subr.bf16.mxu0 %v4471_v27 }
 0x152   : > { %1539 = vmatpush1.bf16.msra.mxu0 %v4469_v28 }
 0x153   : > { %1540 = vmatprep.subr.bf16.mxu0 %v4474_v29 }
 0x156   : > { %1541 = vmatpush1.bf16.msra.mxu0 %v4472_v30 }
 0x157   : > { %1542 = vmatprep.subr.bf16.mxu0 %v4477_v31 }
 0x15a   : > { %1543 = vmatpush1.bf16.msra.mxu0 %v4475_v32 }
 0x15b   : > { %1544 = vmatprep.subr.bf16.mxu0 %v4480_v33 }
 0x15e   : > { %1545 = vmatpush1.bf16.msra.mxu0 %v4478_v34 }
 0x15f   : > { %1546 = vmatprep.subr.bf16.mxu0 %v4483_v35 }
 0x162   : > { %1547 = vmatpush1.bf16.msra.mxu0 %v4481_v36 }
 0x163   : > { %1548 = vmatprep.subr.bf16.mxu0 %v4486_v37 }
 0x166   : > { %1549 = vmatpush1.bf16.msra.mxu0 %v4484_v38 }
 0x167   : > { %4210 = vmatprep.subr.bf16.mxu0 %v5074_v39 }
 0x169   : > { %1551 = vmatmul.mubr.bf16.vlgmr.msra.gmra.mrb[4].mxu0 %v5578_v5  ;;  %v944_v5 = vsub.s32 4, %v927_v41 }
 0x16a   : > { %4212 = vmatprep.mubr.msk.bf16.mxu0 %vm5075_vm0, %v5074_v39 }
 0x16b   : > { %v945_v7 = vrot.slane %v924_v43, %v944_v5  ;;  %v4513_v5 = vld [vmem:[%s5440_s16 + $0x84] ss:$8 sps:$4 sm:$0xff]  }
 0x1fb   : > { %v1511_v47 = vpop.f32.mrb[0].mxu1 }
 0x1fc   : > { %v1512_v50 = vadd.f32 %v1511_v47, %v937_v45  ;;  %v1513_v51 = vpop.f32.mrb[1].mxu1  ;;  %v1470_v56 = vpop.f32.mrb[0].mxu0 }
 0x1fd   : > { %v1515_v52 = vpop.f32.mrb[2].mxu1  ;;  %v1471_v57 = vadd.f32 %v1470_v56, %v929_v49  ;;  %v1472_v58 = vpop.f32.mrb[1].mxu0  ;;  %v1514_v62 = vadd.f32 %v1513_v51, %v941_v54  ;;  %v4489_v49 = vld [vmem:[%s5440_s16 + $0x4] ss:$8 sps:$4 sm:$0xff]   ;;  %v4492_v54 = vld [vmem:[%s5440_s16 + $0x14] ss:$8 sps:$4 sm:$0xff]  }
 0x1fe   : > { %v1561_v53 = vpack.c.bf16 %v1512_v50, %v1512_v50  ;;  %v1516_v55 = vpop.f32.mrb[3].mxu1  ;;  %v1474_v59 = vpop.f32.mrb[2].mxu0  ;;  %v1473_v2 = vadd.f32 %v1472_v58, %v933_v0  ;;  %v4487_v52 = vld [vmem:[%s5440_s16] ss:$8 sps:$4 sm:$0xff]   ;;  %v4495_v56 = vld [vmem:[%s5440_s16 + $0x24] ss:$8 sps:$4 sm:$0xff]  }
 0x1ff   : > { %v1475_v61 = vpop.f32.mrb[3].mxu0  ;;  %v1559_v63 = vpack.c.bf16 %v1471_v57, %v1471_v57  ;;  %v1562_v1 = vpack.c.bf16 %v1514_v62, %v1514_v62  ;;  %v4490_v55 = vld [vmem:[%s5440_s16 + $0x10] ss:$8 sps:$4 sm:$0xff]   ;;  %v4498_v57 = vld [vmem:[%s5440_s16 + $0x34] ss:$8 sps:$4 sm:$0xff]  }
 0x200   : > { %4211 = vmatpush3.bf16.xpose.msra.mxu0 %v1561_v53  ;;  %v1560_v4 = vpack.c.bf16 %v1473_v2, %v1473_v2  ;;  %v4496_v58 = vld [vmem:[%s5440_s16 + $0x30] ss:$8 sps:$4 sm:$0xff]   ;;  %v4501_v59 = vld [vmem:[%s5440_s16 + $0x44] ss:$8 sps:$4 sm:$0xff]   ;;  %v4499_v61 = vld [vmem:[%s5440_s16 + $0x40] ss:$8 sps:$4 sm:$0xff]  }
 0x201   : > { %4216 = vmatprep.subr.bf16.mxu0 %v5074_v39  ;;  %v4504_v62 = vld [vmem:[%s5440_s16 + $0x54] ss:$8 sps:$4 sm:$0xff]   ;;  %v4507_v0 = vld [vmem:[%s5440_s16 + $0x64] ss:$8 sps:$4 sm:$0xff]  }
 0x202   : > { %v4510_v2 = vld [vmem:[%s5440_s16 + $0x74] ss:$8 sps:$4 sm:$0xff]  }
 0x207   : > { %4213 = vmatmul.mubr.bf16.vlgmr.msra.gmra.mrb[8].mxu0 %v1559_v63  ;;  %v4502_v63 = vld [vmem:[%s5440_s16 + $0x50] ss:$8 sps:$4 sm:$0xff]  }
 0x208   : > { %4217 = vmatpush3.bf16.xpose.msra.mxu0 %v1562_v1  ;;  %4218 = vmatprep.mubr.msk.bf16.mxu0 %vm5075_vm0, %v5074_v39  ;;  %v4505_v1 = vld [vmem:[%s5440_s16 + $0x60] ss:$8 sps:$4 sm:$0xff]  }
 0x20f   : > { %4219 = vmatmul.mubr.bf16.vlgmr.msra.gmra.mrb[12].mxu0 %v1560_v4  ;;  %v4508_v4 = vld [vmem:[%s5440_s16 + $0x70] ss:$8 sps:$4 sm:$0xff]  }
 0x23c   : > { %v1552_v9 = vpop.f32.mrb[4].mxu0 }
 0x23d   : > { %v1553_v10 = vadd.f32 %v1552_v9, %v945_v7  ;;  %v1554_v11 = vpop.f32.mrb[5].mxu0  ;;  %v4516_v7 = vld [vmem:[%s5440_s16 + $0x94] ss:$8 sps:$4 sm:$0xff]   ;;  %v4519_v9 = vld [vmem:[%s5440_s16 + $0xa4] ss:$8 sps:$4 sm:$0xff]  }
 0x23e   : > { %v1555_v12 = vadd.f32 %v1554_v11, %v949_v8  ;;  %v1556_v13 = vpop.f32.mrb[6].mxu0  ;;  %v4514_v8 = vld [vmem:[%s5440_s16 + $0x90] ss:$8 sps:$4 sm:$0xff]   ;;  %v4522_v11 = vld [vmem:[%s5440_s16 + $0xb4] ss:$8 sps:$4 sm:$0xff]  }
 0x23f   : > { %v1563_v14 = vpack.c.bf16 %v1553_v10, %v1553_v10  ;;  %v1557_v15 = vpop.f32.mrb[7].mxu0  ;;  %v4517_v10 = vld [vmem:[%s5440_s16 + $0xa0] ss:$8 sps:$4 sm:$0xff]   ;;  %v4525_v13 = vld [vmem:[%s5440_s16 + $0xc4] ss:$8 sps:$4 sm:$0xff]  }
 0x240   : > { %v1564_v16 = vpack.c.bf16 %v1555_v12, %v1555_v12  ;;  %v4520_v12 = vld [vmem:[%s5440_s16 + $0xb0] ss:$8 sps:$4 sm:$0xff]   ;;  %v4528_v15 = vld [vmem:[%s5440_s16 + $0xd4] ss:$8 sps:$4 sm:$0xff]  }
 0x241   : > { %v1675_v17 = vsel %vm1673_vm1, %v1563_v14, 0  ;;  %v4523_v14 = vld [vmem:[%s5440_s16 + $0xc0] ss:$8 sps:$4 sm:$0xff]  }
 0x242   : > { %v1721_v18 = vsel %vm1673_vm1, %v1564_v16, 0  ;;  %4223 = vmatpush3.bf16.msra.mxu1 %v1675_v17  ;;  %v4526_v16 = vld [vmem:[%s5440_s16 + $0xd0] ss:$8 sps:$4 sm:$0xff]   ;;  %v4529_v17 = vld [vmem:[%s5440_s16 + $0xe0] ss:$8 sps:$4 sm:$0xff]  }
 0x243   : > { %4228 = vmatprep.subr.bf16.mxu1 %v5074_v39 }
 0x2da   : > { %v1599_v19 = vpop.f32.mrb[8].mxu0 }
 0x2db   : > { %v4214_v20 = vpop.f32.mrb[9].mxu0  ;;  %v1646_v21 = vsel %vm1645_vm2, %v1599_v19, -inf }
 0x2dc   : > { %1647 = vmax.xlane.f32.xlu0 %v1646_v21  ;;  %v1602_v22 = vpop.f32.mrb[10].mxu0  ;;  %v4532_v20 = vld [vmem:[%s5440_s16 + $0xf0] ss:$8 sps:$4 sm:$0xff]  }
 0x2dd   : > { %v4215_v23 = vpop.f32.mrb[11].mxu0 }
 0x2e2   : > { %v1639_v24 = vpop.f32.mrb[12].mxu0 }
 0x2e3   : > { %v4220_v25 = vpop.f32.mrb[13].mxu0  ;;  %v1649_v26 = vsel %vm1645_vm2, %v1639_v24, -inf }
 0x2e4   : > { %1650 = vmax.xlane.f32.xlu0 %v1649_v26  ;;  %v1642_v27 = vpop.f32.mrb[14].mxu0 }
 0x2e5   : > { %v4221_v28 = vpop.f32.mrb[15].mxu0 }
 0x369   : > { %v1648_v29 = vpop.xlane.xlu0 %1647 }
 0x36a   : > { %v1652_v30 = vsub.f32 %v1599_v19, %v1648_v29  ;;  %v4534_v19 = vld [vmem:[%s5440_s16 + $0xf4] ss:$8 sps:$4 sm:$0xff]  }
 0x36c   : > { %v1654_v31 = vmul.f32 1.442695, %v1652_v30 }
 0x36e   : > { %4727 = vpow2.f32 %v1654_v31  ;;  %v1797_v31 = vld [vmem:[%s6015_s15] sm:$0x3] }
 0x371   : > { %v1651_v32 = vpop.xlane.xlu0 %1650 }
 0x372   : > { %v1653_v33 = vsub.f32 %v1639_v24, %v1651_v32  ;;  %v1802_v32 = vrot.slane %v1797_v31, %v5625_v44 }
 0x374   : > { %v1656_v34 = vmul.f32 1.442695, %v1653_v33  ;;  %v1806_v33 = vrot.slane %v1797_v31, %v5632_v60  ;;  %v4600_v31 = vld [vmem:[%s5446_s14 + $0x14c] ss:$16 sps:$4 sm:$0xff]  }
 0x376   : > { %4729 = vpow2.f32 %v1656_v34 }
 0x378   : > { %v4728_v35 = vpop.eup %4727 }
 0x379   : > { %v1658_v36 = vsel %vm1645_vm2, %v4728_v35, 0.0 }
 0x37a   : > { %1659 = vadd.xlane.f32.xlu1 %v1658_v36 }
 0x380   : > { %v4730_v37 = vpop.eup %4729 }
 0x381   : > { %v1661_v38 = vsel %vm1645_vm2, %v4730_v37, 0.0 }
 0x382   : > { %1662 = vadd.xlane.f32.xlu1 %v1661_v38 }
 0x407   : > { %v1660_v40 = vpop.xlane.xlu1 %1659 }
 0x408   : > { %4731 = vrcp.f32 %v1660_v40 }
 0x40f   : > { %v1663_v41 = vpop.xlane.xlu1 %1662 }
 0x410   : > { %4733 = vrcp.f32 %v1663_v41 }
 0x412   : > { %v4732_v43 = vpop.eup %4731 }
 0x413   : > { %v1666_v45 = vmul.f32 %v4732_v43, %v4728_v35 }
 0x415   : > { %v1668_v47 = vpack.c.bf16 %v1666_v45, %v1666_v45 }
 0x417   : > { %4225 = vmatmul.mubr.msk.bf16.vlgmr.msra.gmra.mrb[4].mxu1 %vm1645_vm2, %v1668_v47  ;;  %v4535_v47 = vld [vmem:[%s5446_s14] ss:$16 sps:$4 sm:$0xff]  }
 0x418   : > { %4229 = vmatpush3.bf16.msra.mxu1 %v1721_v18  ;;  %4230 = vmatprep.mubr.msk.bf16.mxu1 %vm5075_vm0, %v5074_v39  ;;  %v4493_v39 = vld [vmem:[%s5440_s16 + $0x20] ss:$8 sps:$4 sm:$0xff]   ;;  %v4531_v18 = vld [vmem:[%s5440_s16 + $0xe4] ss:$8 sps:$4 sm:$0xff]  }
 0x419   : > { %1969 = vmatprep.subr.bf16.mxu1 %v4489_v49  ;;  %v4537_v49 = vld [vmem:[%s5446_s14 + $0x4] ss:$16 sps:$4 sm:$0xff]  }
 0x41a   : > { %v4734_v50 = vpop.eup %4733  ;;  %2465 = vmatprep.subr.bf16.mxu0 %v4537_v49  ;;  %v4613_v49 = vld [vmem:[%s5446_s14 + $0x1a0] ss:$16 sps:$4 sm:$0xff]  }
 0x41b   : > { %v1667_v51 = vmul.f32 %v4734_v50, %v4730_v37  ;;  %v4538_v50 = vld [vmem:[%s5446_s14 + $0x8] ss:$16 sps:$4 sm:$0xff]   ;;  %2466 = vmatpush1.bf16.msra.mxu0 %v4535_v47  ;;  %v4618_v47 = vld [vmem:[%s5446_s14 + $0x1ac] ss:$16 sps:$4 sm:$0xff]  }
 0x41d   : > { %v1669_v53 = vpack.c.bf16 %v1667_v51, %v1667_v51  ;;  %v4540_v51 = vld [vmem:[%s5446_s14 + $0xc] ss:$16 sps:$4 sm:$0xff]  }
 0x41f   : > { %4231 = vmatmul.mubr.msk.bf16.vlgmr.msra.gmra.mrb[8].mxu1 %vm1645_vm2, %v1669_v53  ;;  %v4544_v53 = vld [vmem:[%s5446_s14 + $0x28] ss:$16 sps:$4 sm:$0xff]  }
 0x420   : > { %1970 = vmatpush1.bf16.msra.mxu1 %v4487_v52  ;;  %v4543_v52 = vld [vmem:[%s5446_s14 + $0x24] ss:$16 sps:$4 sm:$0xff]  }
 0x421   : > { %1971 = vmatprep.subr.bf16.mxu1 %v4492_v54  ;;  %2467 = vmatprep.subr.bf16.mxu0 %v4543_v52  ;;  %v4549_v54 = vld [vmem:[%s5446_s14 + $0x44] ss:$16 sps:$4 sm:$0xff]  }
 0x422   : > { %v4621_v52 = vld [vmem:[%s5446_s14 + $0x1c4] ss:$16 sps:$4 sm:$0xff]  }
 0x424   : > { %1972 = vmatpush1.bf16.msra.mxu1 %v4490_v55  ;;  %v4552_v55 = vld [vmem:[%s5446_s14 + $0x4c] ss:$16 sps:$4 sm:$0xff]  }
 0x425   : > { %1973 = vmatprep.subr.bf16.mxu1 %v4495_v56  ;;  %v4547_v56 = vld [vmem:[%s5446_s14 + $0x40] ss:$16 sps:$4 sm:$0xff]  }
 0x428   : > { %1974 = vmatpush1.bf16.msra.mxu1 %v4493_v39  ;;  %v4550_v39 = vld [vmem:[%s5446_s14 + $0x48] ss:$16 sps:$4 sm:$0xff]  }
 0x429   : > { %1975 = vmatprep.subr.bf16.mxu1 %v4498_v57  ;;  %v4555_v57 = vld [vmem:[%s5446_s14 + $0x64] ss:$16 sps:$4 sm:$0xff]  }
 0x42c   : > { %1976 = vmatpush1.bf16.msra.mxu1 %v4496_v58  ;;  %v4558_v58 = vld [vmem:[%s5446_s14 + $0x6c] ss:$16 sps:$4 sm:$0xff]  }
 0x42d   : > { %1977 = vmatprep.subr.bf16.mxu1 %v4501_v59  ;;  %v4553_v59 = vld [vmem:[%s5446_s14 + $0x60] ss:$16 sps:$4 sm:$0xff]  }
 0x430   : > { %1978 = vmatpush1.bf16.msra.mxu1 %v4499_v61  ;;  %v4556_v61 = vld [vmem:[%s5446_s14 + $0x68] ss:$16 sps:$4 sm:$0xff]  }
 0x431   : > { %1979 = vmatprep.subr.bf16.mxu1 %v4504_v62  ;;  %v4561_v62 = vld [vmem:[%s5446_s14 + $0x84] ss:$16 sps:$4 sm:$0xff]  }
 0x434   : > { %1980 = vmatpush1.bf16.msra.mxu1 %v4502_v63  ;;  %v4564_v63 = vld [vmem:[%s5446_s14 + $0x8c] ss:$16 sps:$4 sm:$0xff]  }
 0x435   : > { %1981 = vmatprep.subr.bf16.mxu1 %v4507_v0  ;;  %v4559_v0 = vld [vmem:[%s5446_s14 + $0x80] ss:$16 sps:$4 sm:$0xff]  }
 0x438   : > { %1982 = vmatpush1.bf16.msra.mxu1 %v4505_v1  ;;  %v4562_v1 = vld [vmem:[%s5446_s14 + $0x88] ss:$16 sps:$4 sm:$0xff]  }
 0x439   : > { %1983 = vmatprep.subr.bf16.mxu1 %v4510_v2  ;;  %v4567_v2 = vld [vmem:[%s5446_s14 + $0xa4] ss:$16 sps:$4 sm:$0xff]  }
 0x43c   : > { %1984 = vmatpush1.bf16.msra.mxu1 %v4508_v4  ;;  %v4570_v4 = vld [vmem:[%s5446_s14 + $0xac] ss:$16 sps:$4 sm:$0xff]  }
 0x43d   : > { %1985 = vmatprep.subr.bf16.mxu1 %v4513_v5  ;;  %v4565_v5 = vld [vmem:[%s5446_s14 + $0xa0] ss:$16 sps:$4 sm:$0xff]  }
 0x440   : > { %1986 = vmatpush1.bf16.msra.mxu1 %v4511_v6  ;;  %v4568_v6 = vld [vmem:[%s5446_s14 + $0xa8] ss:$16 sps:$4 sm:$0xff]  }
 0x441   : > { %1987 = vmatprep.subr.bf16.mxu1 %v4516_v7  ;;  %v4573_v7 = vld [vmem:[%s5446_s14 + $0xc4] ss:$16 sps:$4 sm:$0xff]  }
 0x444   : > { %1988 = vmatpush1.bf16.msra.mxu1 %v4514_v8  ;;  %v4576_v8 = vld [vmem:[%s5446_s14 + $0xcc] ss:$16 sps:$4 sm:$0xff]  }
 0x445   : > { %1989 = vmatprep.subr.bf16.mxu1 %v4519_v9  ;;  %v4571_v9 = vld [vmem:[%s5446_s14 + $0xc0] ss:$16 sps:$4 sm:$0xff]  }
 0x448   : > { %1990 = vmatpush1.bf16.msra.mxu1 %v4517_v10  ;;  %v4574_v10 = vld [vmem:[%s5446_s14 + $0xc8] ss:$16 sps:$4 sm:$0xff]  }
 0x449   : > { %1991 = vmatprep.subr.bf16.mxu1 %v4522_v11  ;;  %v4579_v11 = vld [vmem:[%s5446_s14 + $0xe4] ss:$16 sps:$4 sm:$0xff]  }
 0x44c   : > { %1992 = vmatpush1.bf16.msra.mxu1 %v4520_v12  ;;  %v4582_v12 = vld [vmem:[%s5446_s14 + $0xec] ss:$16 sps:$4 sm:$0xff]  }
 0x44d   : > { %1993 = vmatprep.subr.bf16.mxu1 %v4525_v13  ;;  %v4577_v13 = vld [vmem:[%s5446_s14 + $0xe0] ss:$16 sps:$4 sm:$0xff]  }
 0x450   : > { %1994 = vmatpush1.bf16.msra.mxu1 %v4523_v14  ;;  %v4580_v14 = vld [vmem:[%s5446_s14 + $0xe8] ss:$16 sps:$4 sm:$0xff]  }
 0x451   : > { %1995 = vmatprep.subr.bf16.mxu1 %v4528_v15  ;;  %v4585_v15 = vld [vmem:[%s5446_s14 + $0x104] ss:$16 sps:$4 sm:$0xff]  }
 0x454   : > { %1996 = vmatpush1.bf16.msra.mxu1 %v4526_v16  ;;  %v4588_v16 = vld [vmem:[%s5446_s14 + $0x10c] ss:$16 sps:$4 sm:$0xff]  }
 0x455   : > { %1997 = vmatprep.subr.bf16.mxu1 %v4531_v18  ;;  %v4586_v18 = vld [vmem:[%s5446_s14 + $0x108] ss:$16 sps:$4 sm:$0xff]  }
 0x458   : > { %1998 = vmatpush1.bf16.msra.mxu1 %v4529_v17  ;;  %v4583_v17 = vld [vmem:[%s5446_s14 + $0x100] ss:$16 sps:$4 sm:$0xff]  }
 0x459   : > { %1999 = vmatprep.subr.bf16.mxu1 %v4534_v19  ;;  %v4591_v19 = vld [vmem:[%s5446_s14 + $0x124] ss:$16 sps:$4 sm:$0xff]  }
 0x45c   : > { %2000 = vmatpush1.bf16.msra.mxu1 %v4532_v20  ;;  %v4594_v20 = vld [vmem:[%s5446_s14 + $0x12c] ss:$16 sps:$4 sm:$0xff]  }
 0x45d   : > { %2506 = vmatprep.subr.bf16.mxu1 %v4540_v51  ;;  %v4619_v51 = vld [vmem:[%s5446_s14 + $0x1c0] ss:$16 sps:$4 sm:$0xff]  }
 0x4ea   : > { %v1711_v21 = vpop.f32.mrb[4].mxu1 }
 0x4eb   : > { %v4226_v22 = vpop.f32.mrb[5].mxu1  ;;  %v1763_v28 = vpack.c.bf16 %v1711_v21, %v1711_v21  ;;  %v4589_v21 = vld [vmem:[%s5446_s14 + $0x120] ss:$16 sps:$4 sm:$0xff]  }
 0x4ec   : > { %v1714_v23 = vpop.f32.mrb[6].mxu1  ;;  %v4592_v22 = vld [vmem:[%s5446_s14 + $0x128] ss:$16 sps:$4 sm:$0xff]  }
 0x4ed   : > { %v4227_v24 = vpop.f32.mrb[7].mxu1 }
 0x4f2   : > { %v1757_v25 = vpop.f32.mrb[8].mxu1 }
 0x4f3   : > { %v1764_v26 = vpack.c.bf16 %v1757_v25, %v1757_v25  ;;  %v4232_v27 = vpop.f32.mrb[9].mxu1 }
 0x4f4   : > { %v1760_v29 = vpop.f32.mrb[10].mxu1 }
 0x4f5   : > { %v4233_v30 = vpop.f32.mrb[11].mxu1  ;;  %2001 = vmatprep.mubr.bf16.mxu1 %v1764_v26 }
 0x4f6   : > { %2002 = vmatmul.mubr.bf16.vlgmr.msra.gmra.mrb[12].mxu1 %v1763_v28  ;;  %v4597_v30 = vld [vmem:[%s5446_s14 + $0x144] ss:$16 sps:$4 sm:$0xff]  }
 0x4f7   : > { %2507 = vmatpush1.bf16.msra.mxu1 %v4538_v50  ;;  %v4616_v50 = vld [vmem:[%s5446_s14 + $0x1a8] ss:$16 sps:$4 sm:$0xff]  }
 0x5c9   : > { %v2003_v34 = vpop.f32.mrb[12].mxu1 }
 0x5ca   : > { %v2004_v35 = vadd.f32 %v2003_v34, %v1802_v32  ;;  %v2005_v36 = vpop.f32.mrb[13].mxu1  ;;  %v4595_v32 = vld [vmem:[%s5446_s14 + $0x140] ss:$16 sps:$4 sm:$0xff]   ;;  %v4603_v34 = vld [vmem:[%s5446_s14 + $0x164] ss:$16 sps:$4 sm:$0xff]  }
 0x5cb   : > { %v2006_v37 = vadd.f32 %v2005_v36, %v1806_v33  ;;  %v2007_v38 = vpop.f32.mrb[14].mxu1  ;;  %v4598_v33 = vld [vmem:[%s5446_s14 + $0x148] ss:$16 sps:$4 sm:$0xff]   ;;  %v4601_v36 = vld [vmem:[%s5446_s14 + $0x160] ss:$16 sps:$4 sm:$0xff]  }
 0x5cc   : > { %v5687_v40 = vadd.f32 %v2004_v35, %v5573_v3  ;;  %v2008_v41 = vpop.f32.mrb[15].mxu1  ;;  %v4546_v3 = vld [vmem:[%s5446_s14 + $0x2c] ss:$16 sps:$4 sm:$0xff]   ;;  %v4609_v38 = vld [vmem:[%s5446_s14 + $0x184] ss:$16 sps:$4 sm:$0xff]  }
 0x5cd   : > { %v5690_v43 = vadd.f32 %v2006_v37, %v5552_v48  ;;  %v4541_v48 = vld [vmem:[%s5446_s14 + $0x20] ss:$16 sps:$4 sm:$0xff]   ;;  %2508 = vmatprep.subr.bf16.mxu1 %v4546_v3  ;;  %v4606_v35 = vld [vmem:[%s5446_s14 + $0x16c] ss:$16 sps:$4 sm:$0xff]   ;;  %v4604_v37 = vld [vmem:[%s5446_s14 + $0x168] ss:$16 sps:$4 sm:$0xff]  }
 0x5ce   : > { %2468 = vmatpush1.bf16.msra.mxu0 %v4541_v48  ;;  %2509 = vmatpush1.bf16.msra.mxu1 %v4544_v53  ;;  %v4607_v41 = vld [vmem:[%s5446_s14 + $0x180] ss:$16 sps:$4 sm:$0xff]   ;;  %v4622_v3 = vld [vmem:[%s5446_s14 + $0x1c8] ss:$16 sps:$4 sm:$0xff]   ;;  %v4624_v48 = vld [vmem:[%s5446_s14 + $0x1cc] ss:$16 sps:$4 sm:$0xff]  }
 0x5cf   : > { %v2012_v45 = vadd.f32 %v5690_v43, %v5687_v40  ;;  %2469 = vmatprep.subr.bf16.mxu0 %v4549_v54  ;;  %2510 = vmatprep.subr.bf16.mxu1 %v4552_v55  ;;  %v4627_v53 = vld [vmem:[%s5446_s14 + $0x1e4] ss:$16 sps:$4 sm:$0xff]   ;;  %v4630_v54 = vld [vmem:[%s5446_s14 + $0x1ec] ss:$16 sps:$4 sm:$0xff]   ;;  %v4625_v55 = vld [vmem:[%s5446_s14 + $0x1e0] ss:$16 sps:$4 sm:$0xff]  }
 0x5d1   : > { %2013 = vadd.xlane.f32.xlu0 %v2012_v45  ;;  %v4615_v45 = vld [vmem:[%s5446_s14 + $0x1a4] ss:$16 sps:$4 sm:$0xff]  }
 0x5d2   : > { %2470 = vmatpush1.bf16.msra.mxu0 %v4547_v56  ;;  %2511 = vmatpush1.bf16.msra.mxu1 %v4550_v39  ;;  %v4628_v56 = vld [vmem:[%s5446_s14 + $0x1e8] ss:$16 sps:$4 sm:$0xff]   ;;  %v4633_v39 = vld [vmem:[%s5448_s27 + $0x4] ss:$8 sps:$4 sm:$0xff]  }
 0x5d3   : > { %2471 = vmatprep.subr.bf16.mxu0 %v4555_v57  ;;  %2512 = vmatprep.subr.bf16.mxu1 %v4558_v58  ;;  %v4636_v57 = vld [vmem:[%s5448_s27 + $0x104] ss:$8 sps:$4 sm:$0xff]  }
 0x5d6   : > { %2472 = vmatpush1.bf16.msra.mxu0 %v4553_v59  ;;  %2513 = vmatpush1.bf16.msra.mxu1 %v4556_v61 }
 0x5d7   : > { %2473 = vmatprep.subr.bf16.mxu0 %v4561_v62  ;;  %2514 = vmatprep.subr.bf16.mxu1 %v4564_v63  ;;  %v2029_v62 = vld [vmem:[%s6017_s28] sm:$0x3] }
 0x5d8   : > { %v2043_v63 = vld [vmem:[%s792_s7] sm:$0x3] }
 0x5da   : > { %2474 = vmatpush1.bf16.msra.mxu0 %v4559_v0  ;;  %2515 = vmatpush1.bf16.msra.mxu1 %v4562_v1  ;;  %v2034_v0 = vrot.slane %v2029_v62, %v5625_v44  ;;  %v2038_v1 = vrot.slane %v2029_v62, %v5632_v60  ;;  %v4700_v62 = vld [vmem:[%s5448_s27 + $0x1b0] ss:$8 sps:$4 sm:$0xff]  }
 0x5db   : > { %2475 = vmatprep.subr.bf16.mxu0 %v4567_v2  ;;  %2516 = vmatprep.subr.bf16.mxu1 %v4570_v4 }
 0x5de   : > { %2476 = vmatpush1.bf16.msra.mxu0 %v4565_v5  ;;  %2517 = vmatpush1.bf16.msra.mxu1 %v4568_v6  ;;  %v2048_v6 = vrot.slane %v2043_v63, %v5625_v44 }
 0x5df   : > { %2477 = vmatprep.subr.bf16.mxu0 %v4573_v7  ;;  %2518 = vmatprep.subr.bf16.mxu1 %v4576_v8  ;;  %v2052_v7 = vrot.slane %v2043_v63, %v5632_v60  ;;  %v4705_v63 = vld [vmem:[%s5448_s27 + $0xc4] ss:$8 sps:$4 sm:$0xff]  }
 0x5e2   : > { %2478 = vmatpush1.bf16.msra.mxu0 %v4571_v9  ;;  %2519 = vmatpush1.bf16.msra.mxu1 %v4574_v10 }
 0x5e3   : > { %2479 = vmatprep.subr.bf16.mxu0 %v4579_v11  ;;  %2520 = vmatprep.subr.bf16.mxu1 %v4582_v12 }
 0x5e6   : > { %2480 = vmatpush1.bf16.msra.mxu0 %v4577_v13  ;;  %2521 = vmatpush1.bf16.msra.mxu1 %v4580_v14  ;;  %v4631_v14 = vld [vmem:[%s5448_s27] ss:$8 sps:$4 sm:$0xff]  }
 0x5e7   : > { %2481 = vmatprep.subr.bf16.mxu0 %v4585_v15  ;;  %2522 = vmatprep.subr.bf16.mxu1 %v4588_v16  ;;  %v4634_v15 = vld [vmem:[%s5448_s27 + $0x100] ss:$8 sps:$4 sm:$0xff]   ;;  %v4639_v16 = vld [vmem:[%s5448_s27 + $0x14] ss:$8 sps:$4 sm:$0xff]  }
 0x5ea   : > { %2482 = vmatpush1.bf16.msra.mxu0 %v4583_v17  ;;  %2523 = vmatpush1.bf16.msra.mxu1 %v4586_v18  ;;  %v4642_v17 = vld [vmem:[%s5448_s27 + $0x114] ss:$8 sps:$4 sm:$0xff]   ;;  %v4637_v18 = vld [vmem:[%s5448_s27 + $0x10] ss:$8 sps:$4 sm:$0xff]  }
 0x5eb   : > { %2483 = vmatprep.subr.bf16.mxu0 %v4591_v19  ;;  %2524 = vmatprep.subr.bf16.mxu1 %v4594_v20  ;;  %v4640_v19 = vld [vmem:[%s5448_s27 + $0x110] ss:$8 sps:$4 sm:$0xff]   ;;  %v4645_v20 = vld [vmem:[%s5448_s27 + $0x24] ss:$8 sps:$4 sm:$0xff]  }
 0x5ee   : > { %2484 = vmatpush1.bf16.msra.mxu0 %v4589_v21  ;;  %2525 = vmatpush1.bf16.msra.mxu1 %v4592_v22  ;;  %v4648_v21 = vld [vmem:[%s5448_s27 + $0x124] ss:$8 sps:$4 sm:$0xff]   ;;  %v4643_v22 = vld [vmem:[%s5448_s27 + $0x20] ss:$8 sps:$4 sm:$0xff]  }
 0x5ef   : > { %2485 = vmatprep.subr.bf16.mxu0 %v4597_v30  ;;  %2526 = vmatprep.subr.bf16.mxu1 %v4600_v31  ;;  %v4655_v30 = vld [vmem:[%s5448_s27 + $0x40] ss:$8 sps:$4 sm:$0xff]  }
 0x5f0   : > { %v4658_v31 = vld [vmem:[%s5448_s27 + $0x140] ss:$8 sps:$4 sm:$0xff]  }
 0x5f2   : > { %2486 = vmatpush1.bf16.msra.mxu0 %v4595_v32  ;;  %2527 = vmatpush1.bf16.msra.mxu1 %v4598_v33  ;;  %v4663_v32 = vld [vmem:[%s5448_s27 + $0x54] ss:$8 sps:$4 sm:$0xff]  }
 0x5f3   : > { %2487 = vmatprep.subr.bf16.mxu0 %v4603_v34  ;;  %2528 = vmatprep.subr.bf16.mxu1 %v4606_v35  ;;  %v4666_v33 = vld [vmem:[%s5448_s27 + $0x154] ss:$8 sps:$4 sm:$0xff]   ;;  %v4661_v34 = vld [vmem:[%s5448_s27 + $0x50] ss:$8 sps:$4 sm:$0xff]  }
 0x5f4   : > { %v4664_v35 = vld [vmem:[%s5448_s27 + $0x150] ss:$8 sps:$4 sm:$0xff]  }
 0x5f6   : > { %2488 = vmatpush1.bf16.msra.mxu0 %v4601_v36  ;;  %2529 = vmatpush1.bf16.msra.mxu1 %v4604_v37  ;;  %v4669_v36 = vld [vmem:[%s5448_s27 + $0x64] ss:$8 sps:$4 sm:$0xff]  }
 0x5f7   : > { %2489 = vmatprep.subr.bf16.mxu0 %v4609_v38  ;;  %v4672_v37 = vld [vmem:[%s5448_s27 + $0x164] ss:$8 sps:$4 sm:$0xff]   ;;  %v4667_v38 = vld [vmem:[%s5448_s27 + $0x60] ss:$8 sps:$4 sm:$0xff]  }
 0x5fa   : > { %2490 = vmatpush1.bf16.msra.mxu0 %v4607_v41  ;;  %v4675_v41 = vld [vmem:[%s5448_s27 + $0x74] ss:$8 sps:$4 sm:$0xff]  }
 0x5fb   : > { %2491 = vmatprep.subr.bf16.mxu0 %v4615_v45  ;;  %v4673_v45 = vld [vmem:[%s5448_s27 + $0x70] ss:$8 sps:$4 sm:$0xff]  }
 0x5fe   : > { %2492 = vmatpush1.bf16.msra.mxu0 %v4613_v49  ;;  %v4681_v49 = vld [vmem:[%s5448_s27 + $0x84] ss:$8 sps:$4 sm:$0xff]  }
 0x5ff   : > { %2493 = vmatprep.subr.bf16.mxu0 %v4621_v52  ;;  %v4682_v52 = vld [vmem:[%s5448_s27 + $0x180] ss:$8 sps:$4 sm:$0xff]  }
 0x602   : > { %2494 = vmatpush1.bf16.msra.mxu0 %v4619_v51  ;;  %v4679_v51 = vld [vmem:[%s5448_s27 + $0x80] ss:$8 sps:$4 sm:$0xff]  }
 0x603   : > { %2495 = vmatprep.subr.bf16.mxu0 %v4627_v53  ;;  %v4685_v53 = vld [vmem:[%s5448_s27 + $0x90] ss:$8 sps:$4 sm:$0xff]  }
 0x606   : > { %2496 = vmatpush1.bf16.msra.mxu0 %v4625_v55  ;;  %v4693_v55 = vld [vmem:[%s5448_s27 + $0xa4] ss:$8 sps:$4 sm:$0xff]  }
 0x607   : > { %2951 = vmatprep.subr.bf16.mxu0 %v4633_v39  ;;  %v4691_v39 = vld [vmem:[%s5448_s27 + $0xa0] ss:$8 sps:$4 sm:$0xff]  }
 0x65e   : > { %v2014_v23 = vpop.xlane.xlu0 %2013 }
 0x65f   : > { %v2016_v24 = vmul.f32 0.00390625, %v2014_v23  ;;  %v4646_v23 = vld [vmem:[%s5448_s27 + $0x120] ss:$8 sps:$4 sm:$0xff]  }
 0x661   : > { %v5735_v25 = vsub.f32 %v5687_v40, %v2016_v24  ;;  %v5738_v26 = vsub.f32 %v5690_v43, %v2016_v24  ;;  %v4612_v40 = vld [vmem:[%s5446_s14 + $0x18c] ss:$16 sps:$4 sm:$0xff]   ;;  %v4610_v43 = vld [vmem:[%s5446_s14 + $0x188] ss:$16 sps:$4 sm:$0xff]  }
 0x662   : > { %2530 = vmatprep.subr.bf16.mxu1 %v4612_v40  ;;  %v4651_v24 = vld [vmem:[%s5448_s27 + $0x34] ss:$8 sps:$4 sm:$0xff]   ;;  %v4670_v40 = vld [vmem:[%s5448_s27 + $0x160] ss:$8 sps:$4 sm:$0xff]  }
 0x663   : > { %v2019_v27 = vmul.f32 %v5735_v25, %v5735_v25  ;;  %v2020_v28 = vmul.f32 %v5738_v26, %v5738_v26  ;;  %2531 = vmatpush1.bf16.msra.mxu1 %v4610_v43  ;;  %v4678_v43 = vld [vmem:[%s5448_s27 + $0x174] ss:$8 sps:$4 sm:$0xff]  }
 0x664   : > { %2532 = vmatprep.subr.bf16.mxu1 %v4618_v47  ;;  %v4676_v47 = vld [vmem:[%s5448_s27 + $0x170] ss:$8 sps:$4 sm:$0xff]  }
 0x665   : > { %v2021_v29 = vadd.f32 %v2020_v28, %v2019_v27  ;;  %v4652_v27 = vld [vmem:[%s5448_s27 + $0x130] ss:$8 sps:$4 sm:$0xff]   ;;  %v4657_v28 = vld [vmem:[%s5448_s27 + $0x44] ss:$8 sps:$4 sm:$0xff]  }
 0x667   : > { %2022 = vadd.xlane.f32.xlu1 %v2021_v29  ;;  %2533 = vmatpush1.bf16.msra.mxu1 %v4616_v50  ;;  %v4660_v29 = vld [vmem:[%s5448_s27 + $0x144] ss:$8 sps:$4 sm:$0xff]  }
 0x668   : > { %2534 = vmatprep.subr.bf16.mxu1 %v4624_v48  ;;  %v4684_v50 = vld [vmem:[%s5448_s27 + $0x184] ss:$8 sps:$4 sm:$0xff]   ;;  %v4690_v48 = vld [vmem:[%s5448_s27 + $0x194] ss:$8 sps:$4 sm:$0xff]  }
 0x66b   : > { %2535 = vmatpush1.bf16.msra.mxu1 %v4622_v3  ;;  %v4687_v3 = vld [vmem:[%s5448_s27 + $0x94] ss:$8 sps:$4 sm:$0xff]  }
 0x66c   : > { %2536 = vmatprep.subr.bf16.mxu1 %v4630_v54  ;;  %v4688_v54 = vld [vmem:[%s5448_s27 + $0x190] ss:$8 sps:$4 sm:$0xff]  }
 0x66f   : > { %2537 = vmatpush1.bf16.msra.mxu1 %v4628_v56  ;;  %v4696_v56 = vld [vmem:[%s5448_s27 + $0x1a4] ss:$8 sps:$4 sm:$0xff]  }
 0x670   : > { %2992 = vmatprep.subr.bf16.mxu1 %v4636_v57  ;;  %v4694_v57 = vld [vmem:[%s5448_s27 + $0x1a0] ss:$8 sps:$4 sm:$0xff]  }
 0x6f4   : > { %v2023_v58 = vpop.xlane.xlu1 %2022 }
 0x6f5   : > { %v2024_v59 = vmul.f32 0.00390625, %v2023_v58  ;;  %v4699_v58 = vld [vmem:[%s5448_s27 + $0xb4] ss:$8 sps:$4 sm:$0xff]  }
 0x6f7   : > { %v2025_v61 = vadd.f32 1e-05, %v2024_v59  ;;  %v4702_v59 = vld [vmem:[%s5448_s27 + $0x1b4] ss:$8 sps:$4 sm:$0xff]  }
 0x6f9   : > { %4735 = vrsqrt.f32 %v2025_v61  ;;  %v4697_v61 = vld [vmem:[%s5448_s27 + $0xb0] ss:$8 sps:$4 sm:$0xff]  }
 0x703   : > { %v4736_v2 = vpop.eup %4735 }
 0x704   : > { %v2027_v4 = vmul.f32 %v4736_v2, %v5735_v25  ;;  %v2028_v5 = vmul.f32 %v4736_v2, %v5738_v26  ;;  %v4654_v25 = vld [vmem:[%s5448_s27 + $0x134] ss:$8 sps:$4 sm:$0xff]   ;;  %v4649_v26 = vld [vmem:[%s5448_s27 + $0x30] ss:$8 sps:$4 sm:$0xff]   ;;  %v4706_v2 = vld [vmem:[%s5448_s27 + $0x1c0] ss:$8 sps:$4 sm:$0xff]  }
 0x706   : > { %v2042_v8 = vmul.f32 %v2038_v1, %v2028_v5  ;;  %v2041_v9 = vmul.f32 %v2034_v0, %v2027_v4  ;;  %v4708_v0 = vld [vmem:[%s5448_s27 + $0x1c4] ss:$8 sps:$4 sm:$0xff]   ;;  %v4703_v1 = vld [vmem:[%s5448_s27 + $0xc0] ss:$8 sps:$4 sm:$0xff]   ;;  %v4711_v4 = vld [vmem:[%s5448_s27 + $0xd4] ss:$8 sps:$4 sm:$0xff]  }
 0x707   : > { %v4714_v5 = vld [vmem:[%s5448_s27 + $0x1d4] ss:$8 sps:$4 sm:$0xff]  }
 0x708   : > { %v5786_v10 = vadd.f32 %v2052_v7, %v2042_v8  ;;  %v5788_v11 = vadd.f32 %v2048_v6, %v2041_v9  ;;  %v4709_v6 = vld [vmem:[%s5448_s27 + $0xd0] ss:$8 sps:$4 sm:$0xff]   ;;  %v4717_v8 = vld [vmem:[%s5448_s27 + $0xe4] ss:$8 sps:$4 sm:$0xff]  }
 0x709   : > { %v4712_v7 = vld [vmem:[%s5448_s27 + $0x1d0] ss:$8 sps:$4 sm:$0xff]   ;;  %v4720_v9 = vld [vmem:[%s5448_s27 + $0x1e4] ss:$8 sps:$4 sm:$0xff]  }
 0x70a   : > { %v2058_v12 = vpack.c.bf16 %v5786_v10, %v5786_v10  ;;  %v2057_v13 = vpack.c.bf16 %v5788_v11, %v5788_v11 }
 0x70c   : > { %2497 = vmatprep.mubr.bf16.mxu0 %v2058_v12  ;;  %2538 = vmatprep.mubr.bf16.mxu1 %v2058_v12  ;;  %v4715_v12 = vld [vmem:[%s5448_s27 + $0xe0] ss:$8 sps:$4 sm:$0xff]  }
 0x70d   : > { %2498 = vmatmul.mubr.bf16.vlgmr.msra.gmra.mrb[16].mxu0 %v2057_v13  ;;  %2539 = vmatmul.mubr.bf16.vlgmr.msra.gmra.mrb[16].mxu1 %v2057_v13  ;;  %v4718_v13 = vld [vmem:[%s5448_s27 + $0x1e0] ss:$8 sps:$4 sm:$0xff]  }
 0x70e   : > { %2952 = vmatpush1.bf16.msra.mxu0 %v4631_v14  ;;  %2993 = vmatpush1.bf16.msra.mxu1 %v4634_v15  ;;  %v4723_v14 = vld [vmem:[%s5448_s27 + $0xf4] ss:$8 sps:$4 sm:$0xff]  }
 0x70f   : > { %2953 = vmatprep.subr.bf16.mxu0 %v4639_v16  ;;  %2994 = vmatprep.subr.bf16.mxu1 %v4642_v17  ;;  %v4726_v15 = vld [vmem:[%s5448_s27 + $0x1f4] ss:$8 sps:$4 sm:$0xff]   ;;  %v4721_v16 = vld [vmem:[%s5448_s27 + $0xf0] ss:$8 sps:$4 sm:$0xff]  }
 0x710   : > { %v4724_v17 = vld [vmem:[%s5448_s27 + $0x1f0] ss:$8 sps:$4 sm:$0xff]  }
 0x712   : > { %2954 = vmatpush1.bf16.msra.mxu0 %v4637_v18  ;;  %2995 = vmatpush1.bf16.msra.mxu1 %v4640_v19  ;;  %v2123_v18 = vld [vmem:[%s5487_s19] sm:$0xf] }
 0x713   : > { %2955 = vmatprep.subr.bf16.mxu0 %v4645_v20  ;;  %2996 = vmatprep.subr.bf16.mxu1 %v4648_v21  ;;  %v2128_v19 = vrot.slane %v2123_v18, %v5625_v44  ;;  %v2136_v20 = vrot.slane %v2123_v18, %v5622_v42  ;;  %v2132_v21 = vrot.slane %v2123_v18, %v5632_v60 }
 0x716   : > { %2956 = vmatpush1.bf16.msra.mxu0 %v4643_v22  ;;  %2997 = vmatpush1.bf16.msra.mxu1 %v4646_v23  ;;  %v2140_v22 = vrot.slane %v2123_v18, %v5628_v46 }
 0x717   : > { %2957 = vmatprep.subr.bf16.mxu0 %v4651_v24  ;;  %2998 = vmatprep.subr.bf16.mxu1 %v4654_v25 }
 0x71a   : > { %2958 = vmatpush1.bf16.msra.mxu0 %v4649_v26  ;;  %2999 = vmatpush1.bf16.msra.mxu1 %v4652_v27 }
 0x71b   : > { %2959 = vmatprep.subr.bf16.mxu0 %v4657_v28  ;;  %3000 = vmatprep.subr.bf16.mxu1 %v4660_v29 }
 0x71e   : > { %2960 = vmatpush1.bf16.msra.mxu0 %v4655_v30  ;;  %3001 = vmatpush1.bf16.msra.mxu1 %v4658_v31 }
 0x71f   : > { %2961 = vmatprep.subr.bf16.mxu0 %v4663_v32  ;;  %3002 = vmatprep.subr.bf16.mxu1 %v4666_v33 }
 0x722   : > { %2962 = vmatpush1.bf16.msra.mxu0 %v4661_v34  ;;  %3003 = vmatpush1.bf16.msra.mxu1 %v4664_v35 }
 0x723   : > { %2963 = vmatprep.subr.bf16.mxu0 %v4669_v36  ;;  %3004 = vmatprep.subr.bf16.mxu1 %v4672_v37 }
 0x726   : > { %2964 = vmatpush1.bf16.msra.mxu0 %v4667_v38  ;;  %3005 = vmatpush1.bf16.msra.mxu1 %v4670_v40 }
 0x727   : > { %2965 = vmatprep.subr.bf16.mxu0 %v4675_v41  ;;  %3006 = vmatprep.subr.bf16.mxu1 %v4678_v43 }
 0x72a   : > { %2966 = vmatpush1.bf16.msra.mxu0 %v4673_v45  ;;  %3007 = vmatpush1.bf16.msra.mxu1 %v4676_v47  ;;  %v2619_v47 = vld [vmem:[%s800_s2] sm:$0x3] }
 0x72b   : > { %2967 = vmatprep.subr.bf16.mxu0 %v4681_v49  ;;  %3008 = vmatprep.subr.bf16.mxu1 %v4684_v50  ;;  %v2624_v49 = vrot.slane %v2619_v47, %v5625_v44  ;;  %v2628_v50 = vrot.slane %v2619_v47, %v5632_v60  ;;  %v4767_v47 = vld [vmem:[#allocation10 + $0x80] ss:$16 sps:$4 sm:$0xff] (!%p4130_p9)  }
 0x72e   : > { %2968 = vmatpush1.bf16.msra.mxu0 %v4679_v51  ;;  %3009 = vmatpush1.bf16.msra.mxu1 %v4682_v52 }
 0x72f   : > { %2969 = vmatprep.subr.bf16.mxu0 %v4687_v3  ;;  %3010 = vmatprep.subr.bf16.mxu1 %v4690_v48 }
 0x732   : > { %2970 = vmatpush1.bf16.msra.mxu0 %v4685_v53  ;;  %3011 = vmatpush1.bf16.msra.mxu1 %v4688_v54 }
 0x733   : > { %2971 = vmatprep.subr.bf16.mxu0 %v4693_v55  ;;  %3012 = vmatprep.subr.bf16.mxu1 %v4696_v56 }
 0x736   : > { %2972 = vmatpush1.bf16.msra.mxu0 %v4691_v39  ;;  %3013 = vmatpush1.bf16.msra.mxu1 %v4694_v57 }
 0x737   : > { %2973 = vmatprep.subr.bf16.mxu0 %v4699_v58  ;;  %3014 = vmatprep.subr.bf16.mxu1 %v4702_v59 }
 0x73a   : > { %2974 = vmatpush1.bf16.msra.mxu0 %v4697_v61  ;;  %3015 = vmatpush1.bf16.msra.mxu1 %v4700_v62 }
 0x73b   : > { %2975 = vmatprep.subr.bf16.mxu0 %v4705_v63  ;;  %3016 = vmatprep.subr.bf16.mxu1 %v4708_v0 }
 0x73e   : > { %2976 = vmatpush1.bf16.msra.mxu0 %v4703_v1  ;;  %3017 = vmatpush1.bf16.msra.mxu1 %v4706_v2 }
 0x73f   : > { %2977 = vmatprep.subr.bf16.mxu0 %v4711_v4  ;;  %3018 = vmatprep.subr.bf16.mxu1 %v4714_v5 }
 0x742   : > { %2978 = vmatpush1.bf16.msra.mxu0 %v4709_v6  ;;  %3019 = vmatpush1.bf16.msra.mxu1 %v4712_v7 }
 0x743   : > { %2979 = vmatprep.subr.bf16.mxu0 %v4717_v8  ;;  %3020 = vmatprep.subr.bf16.mxu1 %v4720_v9 }
 0x746   : > { %2980 = vmatpush1.bf16.msra.mxu0 %v4715_v12  ;;  %3021 = vmatpush1.bf16.msra.mxu1 %v4718_v13 }
 0x747   : > { %2981 = vmatprep.subr.bf16.mxu0 %v4723_v14  ;;  %3022 = vmatprep.subr.bf16.mxu1 %v4726_v15 }
 0x74a   : > { %2982 = vmatpush1.bf16.msra.mxu0 %v4721_v16  ;;  %3023 = vmatpush1.bf16.msra.mxu1 %v4724_v17 }
 0x7e0   : > { %v2499_v23 = vpop.f32.mrb[16].mxu0  ;;  %v2540_v24 = vpop.f32.mrb[16].mxu1 }
 0x7e1   : > { %v2500_v25 = vadd.f32 %v2499_v23, %v2128_v19  ;;  %v2541_v26 = vadd.f32 %v2540_v24, %v2136_v20  ;;  %v2501_v27 = vpop.f32.mrb[17].mxu0  ;;  %v2542_v28 = vpop.f32.mrb[17].mxu1  ;;  %v4739_v24 = vld [vmem:[#allocation10 + $0x4] ss:$16 sps:$4 sm:$0xff] (!%p4130_p9)  }
 0x7e2   : > { %v2502_v29 = vadd.f32 %v2501_v27, %v2132_v21  ;;  %v2543_v30 = vadd.f32 %v2542_v28, %v2140_v22  ;;  %v2503_v31 = vpop.f32.mrb[18].mxu0  ;;  %v2544_v32 = vpop.f32.mrb[18].mxu1  ;;  %3493 = vmatprep.subr.bf16.mxu0 (!%p4130_p9), %v4739_v24  ;;  %v4743_v27 = vld [vmem:[#allocation10] ss:$16 sps:$4 sm:$0xff] (!%p4130_p9)   ;;  %v4744_v28 = vld [vmem:[#allocation10 + $0x8] ss:$16 sps:$4 sm:$0xff] (!%p4130_p9)  }
 0x7e3   : > { %v2547_v33 = vmax.f32 %v2500_v25, 0.0  ;;  %v2549_v34 = vmax.f32 %v2541_v26, 0.0  ;;  %v2504_v35 = vpop.f32.mrb[19].mxu0  ;;  %v2545_v36 = vpop.f32.mrb[19].mxu1  ;;  %v4741_v26 = vld [vmem:[#allocation10 + $0xc] ss:$16 sps:$4 sm:$0xff] (!%p4130_p9)  }
 0x7e4   : > { %v2548_v37 = vmax.f32 %v2502_v29, 0.0  ;;  %v2550_v38 = vmax.f32 %v2543_v30, 0.0  ;;  %3534 = vmatprep.subr.bf16.mxu1 (!%p4130_p9), %v4741_v26  ;;  %v4745_v29 = vld [vmem:[#allocation10 + $0x24] ss:$16 sps:$4 sm:$0xff] (!%p4130_p9)   ;;  %v4747_v30 = vld [vmem:[#allocation10 + $0x2c] ss:$16 sps:$4 sm:$0xff] (!%p4130_p9)  }
 0x7e5   : > { %v2551_v43 = vpack.c.bf16 %v2547_v33, %v2547_v33  ;;  %v2553_v45 = vpack.c.bf16 %v2549_v34, %v2549_v34  ;;  %v4749_v31 = vld [vmem:[#allocation10 + $0x20] ss:$16 sps:$4 sm:$0xff] (!%p4130_p9)   ;;  %v4750_v32 = vld [vmem:[#allocation10 + $0x28] ss:$16 sps:$4 sm:$0xff] (!%p4130_p9)   ;;  %v4751_v33 = vld [vmem:[#allocation10 + $0x44] ss:$16 sps:$4 sm:$0xff] (!%p4130_p9)  }
 0x7e6   : > { %v2552_v40 = vpack.c.bf16 %v2548_v37, %v2548_v37  ;;  %v2554_v41 = vpack.c.bf16 %v2550_v38, %v2550_v38  ;;  %v4753_v34 = vld [vmem:[#allocation10 + $0x4c] ss:$16 sps:$4 sm:$0xff] (!%p4130_p9)   ;;  %v4755_v35 = vld [vmem:[#allocation10 + $0x40] ss:$16 sps:$4 sm:$0xff] (!%p4130_p9)   ;;  %v4756_v36 = vld [vmem:[#allocation10 + $0x48] ss:$16 sps:$4 sm:$0xff] (!%p4130_p9)  }
 0x7e7   : > { %v4757_v37 = vld [vmem:[#allocation10 + $0x64] ss:$16 sps:$4 sm:$0xff] (!%p4130_p9)   ;;  %v4759_v38 = vld [vmem:[#allocation10 + $0x6c] ss:$16 sps:$4 sm:$0xff] (!%p4130_p9)   ;;  %v4827_v24 = vld [vmem:[#allocation10 + $0x1c0] ss:$16 sps:$4 sm:$0xff] (!%p4130_p9)  }
 0x7e8   : > { %2983 = vmatprep.mubr.bf16.mxu0 %v2552_v40  ;;  %3024 = vmatprep.mubr.bf16.mxu1 %v2554_v41  ;;  %v4761_v40 = vld [vmem:[#allocation10 + $0x60] ss:$16 sps:$4 sm:$0xff] (!%p4130_p9)   ;;  %v4762_v41 = vld [vmem:[#allocation10 + $0x68] ss:$16 sps:$4 sm:$0xff] (!%p4130_p9)   ;;  %v4829_v26 = vld [vmem:[#allocation10 + $0x1e4] ss:$16 sps:$4 sm:$0xff] (!%p4130_p9)  }
 0x7e9   : > { %2984 = vmatmul.mubr.bf16.vlgmr.msra.gmra.mrb[20].mxu0 %v2551_v43  ;;  %3025 = vmatmul.mubr.bf16.vlgmr.msra.gmra.mrb[20].mxu1 %v2553_v45  ;;  %v4763_v43 = vld [vmem:[#allocation10 + $0x84] ss:$16 sps:$4 sm:$0xff] (!%p4130_p9)   ;;  %v4765_v45 = vld [vmem:[#allocation10 + $0x8c] ss:$16 sps:$4 sm:$0xff] (!%p4130_p9)  }
 0x7ea   : > { %3494 = vmatpush1.bf16.msra.mxu0 (!%p4130_p9), %v4743_v27  ;;  %3535 = vmatpush1.bf16.msra.mxu1 (!%p4130_p9), %v4744_v28  ;;  %v4831_v27 = vld [vmem:[#allocation10 + $0x1ec] ss:$16 sps:$4 sm:$0xff] (!%p4130_p9)   ;;  %v4833_v28 = vld [vmem:[#allocation10 + $0x1e0] ss:$16 sps:$4 sm:$0xff] (!%p4130_p9)  }
 0x7eb   : > { %3495 = vmatprep.subr.bf16.mxu0 (!%p4130_p9), %v4745_v29  ;;  %3536 = vmatprep.subr.bf16.mxu1 (!%p4130_p9), %v4747_v30  ;;  %v4834_v29 = vld [vmem:[#allocation10 + $0x1e8] ss:$16 sps:$4 sm:$0xff] (!%p4130_p9)  }
 0x7ee   : > { %3496 = vmatpush1.bf16.msra.mxu0 (!%p4130_p9), %v4749_v31  ;;  %3537 = vmatpush1.bf16.msra.mxu1 (!%p4130_p9), %v4750_v32  ;;  %v3151_v31 = vld [vmem:[%s6022_s22] sm:$0xf] (!%p4130_p9) }
 0x7ef   : > { %3497 = vmatprep.subr.bf16.mxu0 (!%p4130_p9), %v4751_v33  ;;  %3538 = vmatprep.subr.bf16.mxu1 (!%p4130_p9), %v4753_v34  ;;  %v3156_v32 = vrot.slane (!%p4130_p9), %v3151_v31, %v5625_v44  ;;  %v3164_v33 = vrot.slane (!%p4130_p9), %v3151_v31, %v5622_v42  ;;  %v3160_v34 = vrot.slane (!%p4130_p9), %v3151_v31, %v5632_v60 }
 0x7f2   : > { %3498 = vmatpush1.bf16.msra.mxu0 (!%p4130_p9), %v4755_v35  ;;  %3539 = vmatpush1.bf16.msra.mxu1 (!%p4130_p9), %v4756_v36  ;;  %v3168_v35 = vrot.slane (!%p4130_p9), %v3151_v31, %v5628_v46 }
 0x7f3   : > { %3499 = vmatprep.subr.bf16.mxu0 (!%p4130_p9), %v4757_v37  ;;  %3540 = vmatprep.subr.bf16.mxu1 (!%p4130_p9), %v4759_v38 }
 0x7f6   : > { %3500 = vmatpush1.bf16.msra.mxu0 (!%p4130_p9), %v4761_v40  ;;  %3541 = vmatpush1.bf16.msra.mxu1 (!%p4130_p9), %v4762_v41 }
 0x7f7   : > { %3501 = vmatprep.subr.bf16.mxu0 (!%p4130_p9), %v4763_v43  ;;  %3542 = vmatprep.subr.bf16.mxu1 (!%p4130_p9), %v4765_v45 }
 0x7fa   : > { %3502 = vmatpush1.bf16.msra.mxu0 (!%p4130_p9), %v4767_v47 }
 0x8bc   : > { %v2985_v51 = vpop.f32.mrb[20].mxu0  ;;  %v3026_v52 = vpop.f32.mrb[20].mxu1 }
 0x8bd   : > { %v2986_v3 = vadd.f32 %v2985_v51, %v2624_v49  ;;  %v2987_v48 = vpop.f32.mrb[21].mxu0  ;;  %v3028_v53 = vpop.f32.mrb[21].mxu1  ;;  %v4768_v49 = vld [vmem:[#allocation10 + $0x88] ss:$16 sps:$4 sm:$0xff] (!%p4130_p9)   ;;  %v4771_v51 = vld [vmem:[#allocation10 + $0xac] ss:$16 sps:$4 sm:$0xff] (!%p4130_p9)  }
 0x8be   : > { %v2988_v54 = vadd.f32 %v2987_v48, %v2628_v50  ;;  %v2989_v55 = vpop.f32.mrb[22].mxu0  ;;  %v3030_v56 = vpop.f32.mrb[22].mxu1  ;;  %v4769_v50 = vld [vmem:[#allocation10 + $0xa4] ss:$16 sps:$4 sm:$0xff] (!%p4130_p9)   ;;  %3543 = vmatpush1.bf16.msra.mxu1 (!%p4130_p9), %v4768_v49 }
 0x8bf   : > { %v3027_v39 = vadd.f32 %v3026_v52, %v2986_v3  ;;  %v2990_v57 = vpop.f32.mrb[23].mxu0  ;;  %v3031_v58 = vpop.f32.mrb[23].mxu1  ;;  %v4773_v52 = vld [vmem:[#allocation10 + $0xa0] ss:$16 sps:$4 sm:$0xff] (!%p4130_p9)   ;;  %v4774_v3 = vld [vmem:[#allocation10 + $0xa8] ss:$16 sps:$4 sm:$0xff] (!%p4130_p9)   ;;  %3503 = vmatprep.subr.bf16.mxu0 (!%p4130_p9), %v4769_v50  ;;  %3544 = vmatprep.subr.bf16.mxu1 (!%p4130_p9), %v4771_v51 }
 0x8c0   : > { %v3029_v59 = vadd.f32 %v3028_v53, %v2988_v54  ;;  %v4775_v48 = vld [vmem:[#allocation10 + $0xc4] ss:$16 sps:$4 sm:$0xff] (!%p4130_p9)   ;;  %v4777_v53 = vld [vmem:[#allocation10 + $0xcc] ss:$16 sps:$4 sm:$0xff] (!%p4130_p9)   ;;  %v4779_v54 = vld [vmem:[#allocation10 + $0xc0] ss:$16 sps:$4 sm:$0xff] (!%p4130_p9)   ;;  %3504 = vmatpush1.bf16.msra.mxu0 (!%p4130_p9), %v4773_v52 }
 0x8c1   : > { %v3033_v61 = vadd.f32 %v3027_v39, %v5788_v11  ;;  %v3065_v11 = vld [vmem:[%s808_s17] sm:$0x3]  ;;  %v4780_v55 = vld [vmem:[#allocation10 + $0xc8] ss:$16 sps:$4 sm:$0xff] (!%p4130_p9)   ;;  %v4781_v56 = vld [vmem:[#allocation10 + $0xe4] ss:$16 sps:$4 sm:$0xff] (!%p4130_p9)   ;;  %3505 = vmatprep.subr.bf16.mxu0 (!%p4130_p9), %v4775_v48 }
 0x8c2   : > { %v3034_v62 = vadd.f32 %v3029_v59, %v5786_v10  ;;  %v3051_v10 = vld [vmem:[%s804_s29] sm:$0x3]  ;;  %v3070_v16 = vrot.slane %v3065_v11, %v5625_v44  ;;  %v3074_v17 = vrot.slane %v3065_v11, %v5632_v60  ;;  %3545 = vmatpush1.bf16.msra.mxu1 (!%p4130_p9), %v4774_v3  ;;  %v4783_v39 = vld [vmem:[#allocation10 + $0xec] ss:$16 sps:$4 sm:$0xff] (!%p4130_p9)   ;;  %v4786_v58 = vld [vmem:[#allocation10 + $0xe8] ss:$16 sps:$4 sm:$0xff] (!%p4130_p9)  }
 0x8c3   : > { %v3056_v13 = vrot.slane %v3051_v10, %v5625_v44  ;;  %v3060_v14 = vrot.slane %v3051_v10, %v5632_v60  ;;  %3546 = vmatprep.subr.bf16.mxu1 (!%p4130_p9), %v4777_v53  ;;  %v4785_v57 = vld [vmem:[#allocation10 + $0xe0] ss:$16 sps:$4 sm:$0xff] (!%p4130_p9)   ;;  %v4787_v59 = vld [vmem:[#allocation10 + $0x104] ss:$16 sps:$4 sm:$0xff] (!%p4130_p9)   ;;  %v4810_v11 = vld [vmem:[#allocation10 + $0x168] ss:$16 sps:$4 sm:$0xff] (!%p4130_p9)  }
 0x8c4   : > { %v3035_v63 = vadd.f32 %v3034_v62, %v3033_v61  ;;  %3506 = vmatpush1.bf16.msra.mxu0 (!%p4130_p9), %v4779_v54  ;;  %v4809_v10 = vld [vmem:[#allocation10 + $0x160] ss:$16 sps:$4 sm:$0xff] (!%p4130_p9)  }
 0x8c5   : > { %3507 = vmatprep.subr.bf16.mxu0 (!%p4130_p9), %v4781_v56 }
 0x8c6   : > { %3036 = vadd.xlane.f32.xlu0 %v3035_v63  ;;  %3547 = vmatpush1.bf16.msra.mxu1 (!%p4130_p9), %v4780_v55  ;;  %v4792_v63 = vld [vmem:[#allocation10 + $0x108] ss:$16 sps:$4 sm:$0xff] (!%p4130_p9)  }
 0x8c7   : > { %3548 = vmatprep.subr.bf16.mxu1 (!%p4130_p9), %v4783_v39 }
 0x8c8   : > { %3508 = vmatpush1.bf16.msra.mxu0 (!%p4130_p9), %v4785_v57 }
 0x8c9   : > { %3509 = vmatprep.subr.bf16.mxu0 (!%p4130_p9), %v4787_v59 }
 0x8ca   : > { %3549 = vmatpush1.bf16.msra.mxu1 (!%p4130_p9), %v4786_v58 }
 0x953   : > { %v3037_v0 = vpop.xlane.xlu0 %3036 }
 0x954   : > { %v3038_v1 = vmul.f32 0.00390625, %v3037_v0  ;;  %v4793_v0 = vld [vmem:[#allocation10 + $0x124] ss:$16 sps:$4 sm:$0xff] (!%p4130_p9)  }
 0x956   : > { %v3039_v2 = vsub.f32 %v3033_v61, %v3038_v1  ;;  %v3040_v4 = vsub.f32 %v3034_v62, %v3038_v1  ;;  %v4789_v61 = vld [vmem:[#allocation10 + $0x10c] ss:$16 sps:$4 sm:$0xff] (!%p4130_p9)   ;;  %v4791_v62 = vld [vmem:[#allocation10 + $0x100] ss:$16 sps:$4 sm:$0xff] (!%p4130_p9)  }
 0x957   : > { %3550 = vmatprep.subr.bf16.mxu1 (!%p4130_p9), %v4789_v61  ;;  %v4795_v1 = vld [vmem:[#allocation10 + $0x12c] ss:$16 sps:$4 sm:$0xff] (!%p4130_p9)   ;;  %3510 = vmatpush1.bf16.msra.mxu0 (!%p4130_p9), %v4791_v62 }
 0x958   : > { %v3041_v5 = vmul.f32 %v3039_v2, %v3039_v2  ;;  %v3042_v6 = vmul.f32 %v3040_v4, %v3040_v4  ;;  %3551 = vmatpush1.bf16.msra.mxu1 (!%p4130_p9), %v4792_v63  ;;  %3511 = vmatprep.subr.bf16.mxu0 (!%p4130_p9), %v4793_v0 }
 0x959   : > { %3552 = vmatprep.subr.bf16.mxu1 (!%p4130_p9), %v4795_v1 }
 0x95a   : > { %v3043_v7 = vadd.f32 %v3042_v6, %v3041_v5  ;;  %v4799_v5 = vld [vmem:[#allocation10 + $0x144] ss:$16 sps:$4 sm:$0xff] (!%p4130_p9)   ;;  %v4801_v6 = vld [vmem:[#allocation10 + $0x14c] ss:$16 sps:$4 sm:$0xff] (!%p4130_p9)  }
 0x95c   : > { %3044 = vadd.xlane.f32.xlu1 %v3043_v7  ;;  %v4803_v7 = vld [vmem:[#allocation10 + $0x140] ss:$16 sps:$4 sm:$0xff] (!%p4130_p9)  }
 0x9e9   : > { %v3045_v8 = vpop.xlane.xlu1 %3044 }
 0x9ea   : > { %v3046_v9 = vmul.f32 0.00390625, %v3045_v8  ;;  %v4804_v8 = vld [vmem:[#allocation10 + $0x148] ss:$16 sps:$4 sm:$0xff] (!%p4130_p9)  }
 0x9ec   : > { %v3047_v12 = vadd.f32 1e-05, %v3046_v9  ;;  %v4805_v9 = vld [vmem:[#allocation10 + $0x164] ss:$16 sps:$4 sm:$0xff] (!%p4130_p9)  }
 0x9ee   : > { %4737 = vrsqrt.f32 %v3047_v12  ;;  %v4807_v12 = vld [vmem:[#allocation10 + $0x16c] ss:$16 sps:$4 sm:$0xff] (!%p4130_p9)  }
 0x9f8   : > { %v4738_v15 = vpop.eup %4737 }
 0x9f9   : > { %v3049_v18 = vmul.f32 %v4738_v15, %v3039_v2  ;;  %v3050_v19 = vmul.f32 %v4738_v15, %v3040_v4  ;;  %3084 = sbr.rel (%p4130_p9) target bundleno = 2797 (0xaed), region = 108  ;;  %v4797_v2 = vld [vmem:[#allocation10 + $0x120] ss:$16 sps:$4 sm:$0xff] (!%p4130_p9)   ;;  %v4798_v4 = vld [vmem:[#allocation10 + $0x128] ss:$16 sps:$4 sm:$0xff] (!%p4130_p9)  }
 0x9fa   : > { %3512 = vmatpush1.bf16.msra.mxu0 (!%p4130_p9), %v4797_v2  ;;  %3553 = vmatpush1.bf16.msra.mxu1 (!%p4130_p9), %v4798_v4  ;;  %v4815_v15 = vld [vmem:[#allocation10 + $0x180] ss:$16 sps:$4 sm:$0xff] (!%p4130_p9)  }
 0x9fb   : > { %v3063_v20 = vmul.f32 %v3056_v13, %v3049_v18  ;;  %v3064_v21 = vmul.f32 %v3060_v14, %v3050_v19  ;;  %3513 = vmatprep.subr.bf16.mxu0 (!%p4130_p9), %v4799_v5  ;;  %3554 = vmatprep.subr.bf16.mxu1 (!%p4130_p9), %v4801_v6  ;;  %v4811_v13 = vld [vmem:[#allocation10 + $0x184] ss:$16 sps:$4 sm:$0xff] (!%p4130_p9)   ;;  %v4813_v14 = vld [vmem:[#allocation10 + $0x18c] ss:$16 sps:$4 sm:$0xff] (!%p4130_p9)   ;;  %v4821_v19 = vld [vmem:[#allocation10 + $0x1a0] ss:$16 sps:$4 sm:$0xff] (!%p4130_p9)  }
 0x9fc   : > { %v4819_v18 = vld [vmem:[#allocation10 + $0x1ac] ss:$16 sps:$4 sm:$0xff] (!%p4130_p9)  }
 0x9fd   : > { %v5884_v22 = vadd.f32 %v3070_v16, %v3063_v20  ;;  %v3078_v23 = vadd.f32 %v3074_v17, %v3064_v21  ;;  %v4816_v16 = vld [vmem:[#allocation10 + $0x188] ss:$16 sps:$4 sm:$0xff] (!%p4130_p9)   ;;  %v4817_v17 = vld [vmem:[#allocation10 + $0x1a4] ss:$16 sps:$4 sm:$0xff] (!%p4130_p9)  }
 0x9fe   : > { %3514 = vmatpush1.bf16.msra.mxu0 (!%p4130_p9), %v4803_v7  ;;  %3555 = vmatpush1.bf16.msra.mxu1 (!%p4130_p9), %v4804_v8  ;;  %v4822_v20 = vld [vmem:[#allocation10 + $0x1a8] ss:$16 sps:$4 sm:$0xff] (!%p4130_p9)   ;;  %v4823_v21 = vld [vmem:[#allocation10 + $0x1c4] ss:$16 sps:$4 sm:$0xff] (!%p4130_p9)  }
 0x9ff   : > { %3079 = vst [vmem:[#allocation2] sm:$0xff] %v5884_v22  ;;  %3080 = vst [vmem:[#allocation2 + $0x8] sm:$0xff] %v3078_v23  ;;  %v3086_v25 = vpack.c.bf16 (!%p4130_p9), %v3078_v23, %v3078_v23  ;;  %3515 = vmatprep.subr.bf16.mxu0 (!%p4130_p9), %v4805_v9  ;;  %3556 = vmatprep.subr.bf16.mxu1 (!%p4130_p9), %v4807_v12  ;;  %v4825_v23 = vld [vmem:[#allocation10 + $0x1cc] ss:$16 sps:$4 sm:$0xff] (!%p4130_p9)   ;;  %v3085_v30 = vpack.c.bf16 (!%p4130_p9), %v5884_v22, %v5884_v22 }
 0xa01   : > { %3525 = vmatprep.mubr.bf16.mxu0 %v3086_v25  ;;  %3566 = vmatprep.mubr.bf16.mxu1 %v3086_v25  ;;  %v4828_v25 = vld [vmem:[#allocation10 + $0x1c8] ss:$16 sps:$4 sm:$0xff]  }
 0xa02   : > { %3516 = vmatpush1.bf16.msra.mxu0 %v4809_v10  ;;  %3557 = vmatpush1.bf16.msra.mxu1 %v4810_v11 }
 0xa03   : > { %3517 = vmatprep.subr.bf16.mxu0 %v4811_v13  ;;  %3558 = vmatprep.subr.bf16.mxu1 %v4813_v14 }
 0xa06   : > { %3518 = vmatpush1.bf16.msra.mxu0 %v4815_v15  ;;  %3559 = vmatpush1.bf16.msra.mxu1 %v4816_v16 }
 0xa07   : > { %3519 = vmatprep.subr.bf16.mxu0 %v4817_v17  ;;  %3560 = vmatprep.subr.bf16.mxu1 %v4819_v18 }
 0xa0a   : > { %3520 = vmatpush1.bf16.msra.mxu0 %v4821_v19  ;;  %3561 = vmatpush1.bf16.msra.mxu1 %v4822_v20 }
 0xa0b   : > { %3521 = vmatprep.subr.bf16.mxu0 %v4823_v21  ;;  %3562 = vmatprep.subr.bf16.mxu1 %v4825_v23 }
 0xa0e   : > { %3522 = vmatpush1.bf16.msra.mxu0 %v4827_v24  ;;  %3563 = vmatpush1.bf16.msra.mxu1 %v4828_v25 }
 0xa0f   : > { %3523 = vmatprep.subr.bf16.mxu0 %v4829_v26  ;;  %3564 = vmatprep.subr.bf16.mxu1 %v4831_v27 }
 0xa12   : > { %3524 = vmatpush1.bf16.msra.mxu0 %v4833_v28  ;;  %3565 = vmatpush1.bf16.msra.mxu1 %v4834_v29 }
 0xa15   : > { %3526 = vmatmul.mubr.bf16.vlgmr.msra.gmra.mrb[0].mxu0 %v3085_v30  ;;  %3567 = vmatmul.mubr.bf16.vlgmr.msra.gmra.mrb[0].mxu1 %v3085_v30 }
 0xae8   : > { %v3527_v22 = vpop.f32.mrb[0].mxu0  ;;  %v3568_v36 = vpop.f32.mrb[0].mxu1 }
 0xae9   : > { %v3528_v37 = vadd.f32 %v3527_v22, %v3156_v32  ;;  %v3569_v38 = vadd.f32 %v3568_v36, %v3164_v33  ;;  %v3529_v40 = vpop.f32.mrb[1].mxu0  ;;  %v3570_v41 = vpop.f32.mrb[1].mxu1 }
 0xaea   : > { %v3530_v43 = vadd.f32 %v3529_v40, %v3160_v34  ;;  %v3571_v45 = vadd.f32 %v3570_v41, %v3168_v35  ;;  %v3531_v47 = vpop.f32.mrb[2].mxu0  ;;  %v3572_v49 = vpop.f32.mrb[2].mxu1 }
 0xaeb   : > { %3575 = vst [vmem:[%s5504_s8] sm:$0xff] %v3528_v37  ;;  %3577 = vst [vmem:[%s5504_s8 + $0x10] sm:$0xff] %v3569_v38  ;;  %v3532_v44 = vpop.f32.mrb[3].mxu0  ;;  %v3573_v42 = vpop.f32.mrb[3].mxu1 }
 0xaec   : > { %3576 = vst [vmem:[%s5504_s8 + $0x8] sm:$0xff] %v3530_v43  ;;  %3578 = vst [vmem:[%s5504_s8 + $0x18] sm:$0xff] %v3571_v45 }
 0xaed PF: > { %s6023_s13 = sld [smem:[#allocation19_spill]]  ;;  %s6024_s18 = sld [smem:[#allocation15_spill]] }
 0xaee   : > { %s6025_s19 = sld [smem:[#allocation16_spill]]  ;;  %s6026_s20 = sld [smem:[#allocation22_spill]] }
 0xaef   : > { %s6027_s21 = sld [smem:[#allocation17_spill]]  ;;  %s6028_s22 = sld [smem:[#allocation18_spill]] }
 0xaf0   : > { %s6029_s23 = sld [smem:[#allocation20_spill]]  ;;  %s6030_s24 = sld [smem:[#allocation21_spill]] }
 0xaf3   : > { %s34_s25 = sadd.s32 1, %s6023_s13  }
 0xaf4   : > { %p31_p6 = scmp.ge.s32.totalorder %s34_s25, 6  }
 0xaf6   :  { %33 = sbr.rel (!%p31_p6) target bundleno = 26 (0x1a), region = 196 }
 0xafd   :  { %3600 = vsyncpa [#allocation4], 1 }
 0xafe   :  { %3602 = vsyncpa [#allocation4 + $0x1], 1 }
 0xaff   :  { %3603 = vsyncpa [#allocation6], 1 }
 0xb00   :  { %3605 = vsyncpa [#allocation6 + $0x1], 1 }
 0xb01   :  { %3606 = vsyncpa [#allocation9], 1 }
 0xb02   :  { %3608 = vsyncpa [#allocation9 + $0x1], 1 }

</bundles_post_ra>
